<compile_context>
chip_gen: v7x
topology: tpu7x:2x2x1
jax: 0.10.0
libtpu: 0.0.40
codegen_flags: <defaults>
</compile_context>

<pallas_src>
import jax
import jax.numpy as jnp
from jax import lax
from jax.experimental import pallas as pl
from jax.experimental.pallas import tpu as pltpu
from math import prod

LRELU_SLOPE = 0.01                      # nn.LeakyReLU default negative_slope


# --------------------------- config helpers ------------------------------

def _round_up(v, m):
    return ((v + m - 1) // m) * m


def _tpu_config():
    """Generation-aware (tile_cap, vmem_limit_bytes, bf16_tanh)."""
    kind = ""
    try:
        kind = jax.devices()[0].device_kind.lower()
    except Exception:
        pass
    vmem_cap = None
    try:
        vmem_cap = int(pltpu.get_tpu_info().vmem_capacity_bytes)
    except Exception:
        pass
    if vmem_cap is not None:
        big_vmem = vmem_cap >= 100 * 1024 * 1024      # v5e/v6e: 128 MiB
    elif kind:
        big_vmem = not ("v7" in kind or "7x" in kind)  # v7x: 64 MiB / TC
    else:
        big_vmem = False                               # conservative default
    if big_vmem:
        tile_cap, vmem_limit = 2048, 96 * 1024 * 1024
    else:
        tile_cap, vmem_limit = 1024, 48 * 1024 * 1024
    # bf16 EUP path only exists on v6e/v7x; v5e stays f32.
    bf16_tanh = any(t in kind for t in ("v6", "v7", "7x"))
    return tile_cap, vmem_limit, bf16_tanh


def _tile_and_pad(n, cap):
    """Row tile, padded row count, number of tiles."""
    if n <= cap:
        return n, n, 1
    tile = cap                                   # cap is a multiple of 8
    n_pad = _round_up(n, tile)
    return tile, n_pad, n_pad // tile


def _const2d(i):
    return (0, 0)


def _bytes_of(args):
    return sum(int(a.size) * a.dtype.itemsize for a in args)


def _param_macs(params):
    return sum(int(params[2 * k].size) for k in range(len(params) // 2))


# --------------------------- in-kernel helpers ---------------------------

def _lrelu(x):
    return jnp.where(x > 0, x, LRELU_SLOPE * x)


def _softplus(x):
    # BCEWithLogits(p, t) = softplus(p) - p*t   (numerically stable softplus)
    return jnp.maximum(x, 0.0) + jnp.log1p(jnp.exp(-jnp.abs(x)))


def _mlp_from_refs(x, param_refs, out_act=None, head_as_row=False,
                   bf16_tanh=False):
    """param_refs = [w0, b0, w1, b1, ...] (w bf16, b f32).
    LeakyReLU between layers, optional tanh on the output (decoder).
    If head_as_row, the LAST weight is a (1, in) row applied as a VPU
    multiply + lane reduce (avoids a degenerate N=1 MXU matmul)."""
    n = len(param_refs) // 2
    h = x
    for i in range(n):
        w = param_refs[2 * i][...]
        b = param_refs[2 * i + 1][...]
        last = i == n - 1
        if last and head_as_row:
            h = jnp.sum(h.astype(jnp.float32) * w.astype(jnp.float32),
                        axis=1, keepdims=True) + b
        else:
            h = jnp.dot(h.astype(jnp.bfloat16), w,
                        preferred_element_type=jnp.float32) + b
        if not last:
            h = _lrelu(h)
    if out_act == "tanh":
        if bf16_tanh:
            h = jnp.tanh(h.astype(jnp.bfloat16)).astype(jnp.float32)
        else:
            h = jnp.tanh(h)
    return h


def _row_mask(tile_b, true_b):
    row = (pl.program_id(0) * tile_b
           + lax.broadcasted_iota(jnp.int32, (tile_b, 1), 0))
    return row < true_b


def _store_partial(out_ref, part):
    # part: (1, 1) f32 partial sum -> broadcast to the lane-dense (8, 128)
    # output block owned by this grid step (full unmasked vreg store).
    out_ref[...] = jnp.broadcast_to(part, out_ref.shape).astype(jnp.float32)


# ------------------------------- kernels --------------------------------

def make_rec_kernel(n_enc, n_dec, tile_b, true_b, needs_mask, bf16_tanh):
    def kernel(*refs):
        x_ref = refs[0]
        enc = refs[1:1 + 2 * n_enc]
        dec = refs[1 + 2 * n_enc:1 + 2 * n_enc + 2 * n_dec]
        out_ref = refs[-1]

        x = x_ref[...]                                    # bf16 tile
        h = _mlp_from_refs(x, enc)
        rec = _mlp_from_refs(h, dec, out_act="tanh", bf16_tanh=bf16_tanh)
        d = rec - x.astype(jnp.float32)
        row_sq = jnp.sum(d * d, axis=1, keepdims=True)    # (tile_b, 1)
        if needs_mask:
            row_sq = jnp.where(_row_mask(tile_b, true_b), row_sq, 0.0)
        part = jnp.sum(row_sq, axis=0, keepdims=True)     # (1, 1)
        _store_partial(out_ref, part)
    return kernel


def make_adv1_kernel(n_enc, n_disc, tile_b, true_b, needs_mask):
    def kernel(*refs):
        x_ref, noise_ref = refs[0], refs[1]
        enc = refs[2:2 + 2 * n_enc]
        disc = refs[2 + 2 * n_enc:2 + 2 * n_enc + 2 * n_disc]
        out_ref = refs[-1]

        h = _mlp_from_refs(x_ref[...], enc)
        # discriminator twice with the same resident weights (no concat copy)
        p_fake = _mlp_from_refs(h, disc, head_as_row=True)           # (tb, 1)
        p_real = _mlp_from_refs(noise_ref[...], disc, head_as_row=True)
        # BCE(p,0) = softplus(p);  BCE(p,1) = softplus(p) - p
        row = _softplus(p_fake) + _softplus(p_real) - p_real
        if needs_mask:
            row = jnp.where(_row_mask(tile_b, true_b), row, 0.0)
        part = jnp.sum(row, axis=0, keepdims=True)
        _store_partial(out_ref, part)
    return kernel


def make_adv2_kernel(n_enc, n_disc, tile_b, true_b, needs_mask):
    def kernel(*refs):
        x_ref = refs[0]
        enc = refs[1:1 + 2 * n_enc]
        disc = refs[1 + 2 * n_enc:1 + 2 * n_enc + 2 * n_disc]
        out_ref = refs[-1]

        h = _mlp_from_refs(x_ref[...], enc)
        p = _mlp_from_refs(h, disc, head_as_row=True)                # target 1
        row = _softplus(p) - p
        if needs_mask:
            row = jnp.where(_row_mask(tile_b, true_b), row, 0.0)
        part = jnp.sum(row, axis=0, keepdims=True)
        _store_partial(out_ref, part)
    return kernel


def make_dec_kernel(n_dec, bf16_tanh):
    def kernel(*refs):
        z_ref = refs[0]
        dec = refs[1:1 + 2 * n_dec]
        out_ref = refs[-1]
        out_ref[...] = _mlp_from_refs(z_ref[...], dec, out_act="tanh",
                                      bf16_tanh=bf16_tanh).astype(out_ref.dtype)
    return kernel


# ------------------------------- wrapper ---------------------------------

class AAEPallas:
    """Pallas re-implementation of AAE.forward (training phases + 'sample')."""

    def __init__(self, inc, hidden, enc_hidden, dec_hidden, disc_hidden,
                 key=jax.random.PRNGKey(0)):
        self.inc = tuple(inc)
        self.inc1 = prod(inc)
        self.hidden = hidden
        self.inc1_pad = _round_up(self.inc1, 128)
        self.hidden_pad = _round_up(hidden, 128)
        self.tile_cap, self.vmem_limit, self.bf16_tanh = _tpu_config()

        k_enc, k_dec, k_disc = jax.random.split(key, 3)
        self.enc = self._init_mlp(k_enc, [self.inc1, *enc_hidden, hidden])
        self.dec = self._init_mlp(k_dec, [hidden, *dec_hidden, self.inc1])
        self.disc = self._init_mlp(k_disc, [hidden, *disc_hidden, 1],
                                   head_as_row=True)

    @staticmethod
    def _init_mlp(key, dims, head_as_row=False):
        """PyTorch-Linear-style init, then zero-pad every layer width up to a
        multiple of 128 lanes (mathematically identical outputs).  Weights are
        stored bf16, biases f32.  If head_as_row, the last (in, 1) weight is
        stored as a (1, in_pad) row for the VPU reduce."""
        pdims = [_round_up(d, 128) for d in dims]
        params = []
        n = len(dims) - 1
        for i in range(n):
            key, kw, kb = jax.random.split(key, 3)
            bound = 1.0 / (dims[i] ** 0.5)          # PyTorch Linear default
            w = jax.random.uniform(kw, (dims[i], dims[i + 1]),
                                   jnp.float32, -bound, bound)
            b = jax.random.uniform(kb, (1, dims[i + 1]),
                                   jnp.float32, -bound, bound)
            last = i == n - 1
            if last and head_as_row:
                w_row = jnp.zeros((1, pdims[i]), jnp.float32)
                w_row = w_row.at[:, :dims[i]].set(w.T)
                params += [w_row.astype(jnp.bfloat16), b]      # b: (1, 1) f32
            else:
                wp = jnp.zeros((pdims[i], pdims[i + 1]), jnp.float32)
                wp = wp.at[:dims[i], :dims[i + 1]].set(w)
                bp = jnp.zeros((1, pdims[i + 1]), jnp.float32)
                bp = bp.at[:, :dims[i + 1]].set(b)
                params += [wp.astype(jnp.bfloat16), bp]
        return params

    # ---- shared pallas_call builder for the partial-sum loss kernels ----
    def _loss_call(self, kernel, tiled_args, tiled_specs, params,
                   n_tiles, flops, transcendentals, denom):
        args = list(tiled_args) + list(params)
        in_specs = list(tiled_specs) + [pl.BlockSpec(p.shape, _const2d)
                                        for p in params]
        cost = pl.CostEstimate(flops=int(flops),
                               transcendentals=int(transcendentals),
                               bytes_accessed=_bytes_of(args)
                               + 8 * 128 * 4 * n_tiles)
        out = pl.pallas_call(
            kernel,
            out_shape=jax.ShapeDtypeStruct((8 * n_tiles, 128), jnp.float32),
            grid=(n_tiles,),
            in_specs=in_specs,
            out_specs=pl.BlockSpec((8, 128), lambda i: (i, 0)),
            compiler_params=pltpu.CompilerParams(
                dimension_semantics=("parallel",),   # per-tile partials: safe
                vmem_limit_bytes=self.vmem_limit),
            cost_estimate=cost,
        )(*args)
        partials = out.reshape(n_tiles, 8, 128)[:, 0, 0]
        return jnp.sum(partials) / denom

    def forward(self, x, phase="rec", rng=jax.random.PRNGKey(1)):
        n_enc = len(self.enc) // 2
        n_dec = len(self.dec) // 2
        n_disc = len(self.disc) // 2

        if phase == "sample":
            n = int(x)
            z = jax.random.normal(rng, (n, self.hidden), jnp.float32)
            tile_n, n_pad, n_tiles = _tile_and_pad(n, self.tile_cap)
            zp = jnp.pad(z.astype(jnp.bfloat16),
                         ((0, n_pad - n), (0, self.hidden_pad - self.hidden)))
            cost = pl.CostEstimate(
                flops=2 * n_pad * _param_macs(self.dec),
                transcendentals=n_pad * self.inc1_pad,
                bytes_accessed=_bytes_of([zp] + self.dec)
                + n_pad * self.inc1_pad * 4)
            out = pl.pallas_call(
                make_dec_kernel(n_dec, self.bf16_tanh),
                out_shape=jax.ShapeDtypeStruct((n_pad, self.inc1_pad),
                                               jnp.float32),
                grid=(n_tiles,),
                in_specs=[pl.BlockSpec((tile_n, self.hidden_pad),
                                       lambda i: (i, 0))]
                         + [pl.BlockSpec(p.shape, _const2d) for p in self.dec],
                out_specs=pl.BlockSpec((tile_n, self.inc1_pad),
                                       lambda i: (i, 0)),
                compiler_params=pltpu.CompilerParams(
                    dimension_semantics=("parallel",),
                    vmem_limit_bytes=self.vmem_limit),
                cost_estimate=cost,
            )(zp, *self.dec)
            return out[:n, :self.inc1].reshape(-1, *self.inc)

        B = x.shape[0]
        tile_b, b_pad, n_tiles = _tile_and_pad(B, self.tile_cap)
        needs_mask = b_pad != B

        # nn.Flatten (row-major), bf16 DMA, zero-pad rows/lanes
        xf = x.astype(jnp.float32).reshape(B, -1).astype(jnp.bfloat16)
        xp = jnp.pad(xf, ((0, b_pad - B), (0, self.inc1_pad - self.inc1)))
        x_spec = pl.BlockSpec((tile_b, self.inc1_pad), lambda i: (i, 0))

        if phase == "rec":
            params = self.enc + self.dec
            flops = 2 * b_pad * (_param_macs(self.enc) + _param_macs(self.dec))
            return self._loss_call(
                make_rec_kernel(n_enc, n_dec, tile_b, B, needs_mask,
                                self.bf16_tanh),
                [xp], [x_spec], params, n_tiles,
                flops=flops, transcendentals=b_pad * self.inc1_pad,
                denom=float(B * self.inc1))
        elif phase == "adv1":
            noise = jax.random.normal(rng, (B, self.hidden), jnp.float32)
            np_ = jnp.pad(noise.astype(jnp.bfloat16),
                          ((0, b_pad - B),
                           (0, self.hidden_pad - self.hidden)))
            noise_spec = pl.BlockSpec((tile_b, self.hidden_pad),
                                      lambda i: (i, 0))
            params = self.enc + self.disc
            flops = (2 * b_pad * _param_macs(self.enc)
                     + 2 * (2 * b_pad) * _param_macs(self.disc))
            return self._loss_call(
                make_adv1_kernel(n_enc, n_disc, tile_b, B, needs_mask),
                [xp, np_], [x_spec, noise_spec], params, n_tiles,
                flops=flops, transcendentals=4 * b_pad,
                denom=float(2 * B))
        elif phase == "adv2":
            params = self.enc + self.disc
            flops = 2 * b_pad * (_param_macs(self.enc)
                                 + _param_macs(self.disc))
            return self._loss_call(
                make_adv2_kernel(n_enc, n_disc, tile_b, B, needs_mask),
                [xp], [x_spec], params, n_tiles,
                flops=flops, transcendentals=2 * b_pad,
                denom=float(B))
        else:
            raise ValueError(phase)

# TODO(synk): optimizers()/fit() (Adam updates, backward pass, training loop)
# are host-side training utilities with no forward-kernel equivalent.


# -------------------------------- main -----------------------------------

if __name__ == "__main__":
    key = jax.random.PRNGKey(0)
    k_x, k_noise, k_params = jax.random.split(key, 3)

    inc = (4, 16, 16)                  # -> inc1 = 1024
    model = AAEPallas(inc, hidden=32,
                      enc_hidden=(128, 64),
                      dec_hidden=(64, 128),
                      disc_hidden=(64,),
                      key=k_params)

    x = jax.random.normal(k_x, (2, *inc), jnp.float32)   # (B, C, H, W)

    loss_rec = jax.block_until_ready(model.forward(x, "rec"))
    loss_adv1 = jax.block_until_ready(model.forward(x, "adv1", rng=k_noise))
    loss_adv2 = jax.block_until_ready(model.forward(x, "adv2"))
    samples = jax.block_until_ready(model.forward(3, "sample", rng=k_noise))

    ok = (bool(jnp.isfinite(loss_rec)) and bool(jnp.isfinite(loss_adv1))
          and bool(jnp.isfinite(loss_adv2)) and samples.shape == (3, *inc))
    if ok:
        print("KERNEL_OK")
</pallas_src>

<mosaic_0001>
module attributes {stable_mosaic.version = 11 : i64} {
  func.func @kernel(%arg0: i32, %arg1: memref<2x1024xbf16, #tpu.memory_space<vmem>>, %arg2: memref<1024x128xbf16, #tpu.memory_space<vmem>>, %arg3: memref<1x128xf32, #tpu.memory_space<vmem>>, %arg4: memref<128x128xbf16, #tpu.memory_space<vmem>>, %arg5: memref<1x128xf32, #tpu.memory_space<vmem>>, %arg6: memref<128x128xbf16, #tpu.memory_space<vmem>>, %arg7: memref<1x128xf32, #tpu.memory_space<vmem>>, %arg8: memref<128x128xbf16, #tpu.memory_space<vmem>>, %arg9: memref<1x128xf32, #tpu.memory_space<vmem>>, %arg10: memref<128x128xbf16, #tpu.memory_space<vmem>>, %arg11: memref<1x128xf32, #tpu.memory_space<vmem>>, %arg12: memref<128x1024xbf16, #tpu.memory_space<vmem>>, %arg13: memref<1x1024xf32, #tpu.memory_space<vmem>>, %arg14: memref<8x128xf32, #tpu.memory_space<vmem>>) attributes {dimension_semantics = [#tpu.dimension_semantics<parallel>], iteration_bounds = array<i64: 1>, scalar_prefetch = 0 : i64, scratch_operands = 0 : i64, tpu.core_type = #tpu.core_type<tc>, window_params = [{transform_indices = @transform_0, window_bounds = array<i64: 2, 1024>}, {pipeline_mode = #tpu.pipeline_mode<synchronous>, transform_indices = @transform_1, window_bounds = array<i64: 1024, 128>}, {pipeline_mode = #tpu.pipeline_mode<synchronous>, transform_indices = @transform_2, window_bounds = array<i64: 1, 128>}, {pipeline_mode = #tpu.pipeline_mode<synchronous>, transform_indices = @transform_3, window_bounds = array<i64: 128, 128>}, {pipeline_mode = #tpu.pipeline_mode<synchronous>, transform_indices = @transform_4, window_bounds = array<i64: 1, 128>}, {pipeline_mode = #tpu.pipeline_mode<synchronous>, transform_indices = @transform_5, window_bounds = array<i64: 128, 128>}, {pipeline_mode = #tpu.pipeline_mode<synchronous>, transform_indices = @transform_6, window_bounds = array<i64: 1, 128>}, {pipeline_mode = #tpu.pipeline_mode<synchronous>, transform_indices = @transform_7, window_bounds = array<i64: 128, 128>}, {pipeline_mode = #tpu.pipeline_mode<synchronous>, transform_indices = @transform_8, window_bounds = array<i64: 1, 128>}, {pipeline_mode = #tpu.pipeline_mode<synchronous>, transform_indices = @transform_9, window_bounds = array<i64: 128, 128>}, {pipeline_mode = #tpu.pipeline_mode<synchronous>, transform_indices = @transform_10, window_bounds = array<i64: 1, 128>}, {pipeline_mode = #tpu.pipeline_mode<synchronous>, transform_indices = @transform_11, window_bounds = array<i64: 128, 1024>}, {pipeline_mode = #tpu.pipeline_mode<synchronous>, transform_indices = @transform_12, window_bounds = array<i64: 1, 1024>}, {transform_indices = @transform_13, window_bounds = array<i64: 8, 128>}]} {
    %c0 = arith.constant 0 : index
    %c0_0 = arith.constant 0 : index
    %0 = vector.load %arg1[%c0, %c0_0] : memref<2x1024xbf16, #tpu.memory_space<vmem>>, vector<2x1024xbf16>
    %c0_1 = arith.constant 0 : index
    %c0_2 = arith.constant 0 : index
    %1 = vector.load %arg2[%c0_1, %c0_2] : memref<1024x128xbf16, #tpu.memory_space<vmem>>, vector<1024x128xbf16>
    %c0_3 = arith.constant 0 : index
    %c0_4 = arith.constant 0 : index
    %2 = vector.load %arg3[%c0_3, %c0_4] : memref<1x128xf32, #tpu.memory_space<vmem>>, vector<1x128xf32>
    %cst = arith.constant dense<0.000000e+00> : vector<2x128xf32>
    %3 = tpu.matmul %0, %1, %cst {dimension_numbers = #tpu.dot_dimension_numbers<[1], [0], [0], [1], [0, 0, 1, 1], [], []>} : vector<2x1024xbf16>, vector<1024x128xbf16>, vector<2x128xf32> -> vector<2x128xf32>
    %4 = vector.broadcast %2 : vector<1x128xf32> to vector<2x128xf32>
    %5 = arith.addf %3, %4 : vector<2x128xf32>
    %cst_5 = arith.constant 0.000000e+00 : f32
    %6 = vector.broadcast %cst_5 : f32 to vector<2x128xf32>
    %7 = arith.cmpf ogt, %5, %6 : vector<2x128xf32>
    %cst_6 = arith.constant 0.00999999977 : f32
    %8 = vector.broadcast %cst_6 : f32 to vector<2x128xf32>
    %9 = arith.mulf %8, %5 : vector<2x128xf32>
    %10 = arith.select %7, %5, %9 : vector<2x128xi1>, vector<2x128xf32>
    %c0_7 = arith.constant 0 : index
    %c0_8 = arith.constant 0 : index
    %11 = vector.load %arg4[%c0_7, %c0_8] : memref<128x128xbf16, #tpu.memory_space<vmem>>, vector<128x128xbf16>
    %c0_9 = arith.constant 0 : index
    %c0_10 = arith.constant 0 : index
    %12 = vector.load %arg5[%c0_9, %c0_10] : memref<1x128xf32, #tpu.memory_space<vmem>>, vector<1x128xf32>
    %13 = arith.truncf %10 : vector<2x128xf32> to vector<2x128xbf16>
    %cst_11 = arith.constant dense<0.000000e+00> : vector<2x128xf32>
    %14 = tpu.matmul %13, %11, %cst_11 {dimension_numbers = #tpu.dot_dimension_numbers<[1], [0], [0], [1], [0, 0, 1, 1], [], []>} : vector<2x128xbf16>, vector<128x128xbf16>, vector<2x128xf32> -> vector<2x128xf32>
    %15 = vector.broadcast %12 : vector<1x128xf32> to vector<2x128xf32>
    %16 = arith.addf %14, %15 : vector<2x128xf32>
    %cst_12 = arith.constant 0.000000e+00 : f32
    %17 = vector.broadcast %cst_12 : f32 to vector<2x128xf32>
    %18 = arith.cmpf ogt, %16, %17 : vector<2x128xf32>
    %cst_13 = arith.constant 0.00999999977 : f32
    %19 = vector.broadcast %cst_13 : f32 to vector<2x128xf32>
    %20 = arith.mulf %19, %16 : vector<2x128xf32>
    %21 = arith.select %18, %16, %20 : vector<2x128xi1>, vector<2x128xf32>
    %c0_14 = arith.constant 0 : index
    %c0_15 = arith.constant 0 : index
    %22 = vector.load %arg6[%c0_14, %c0_15] : memref<128x128xbf16, #tpu.memory_space<vmem>>, vector<128x128xbf16>
    %c0_16 = arith.constant 0 : index
    %c0_17 = arith.constant 0 : index
    %23 = vector.load %arg7[%c0_16, %c0_17] : memref<1x128xf32, #tpu.memory_space<vmem>>, vector<1x128xf32>
    %24 = arith.truncf %21 : vector<2x128xf32> to vector<2x128xbf16>
    %cst_18 = arith.constant dense<0.000000e+00> : vector<2x128xf32>
    %25 = tpu.matmul %24, %22, %cst_18 {dimension_numbers = #tpu.dot_dimension_numbers<[1], [0], [0], [1], [0, 0, 1, 1], [], []>} : vector<2x128xbf16>, vector<128x128xbf16>, vector<2x128xf32> -> vector<2x128xf32>
    %26 = vector.broadcast %23 : vector<1x128xf32> to vector<2x128xf32>
    %27 = arith.addf %25, %26 : vector<2x128xf32>
    %c0_19 = arith.constant 0 : index
    %c0_20 = arith.constant 0 : index
    %28 = vector.load %arg8[%c0_19, %c0_20] : memref<128x128xbf16, #tpu.memory_space<vmem>>, vector<128x128xbf16>
    %c0_21 = arith.constant 0 : index
    %c0_22 = arith.constant 0 : index
    %29 = vector.load %arg9[%c0_21, %c0_22] : memref<1x128xf32, #tpu.memory_space<vmem>>, vector<1x128xf32>
    %30 = arith.truncf %27 : vector<2x128xf32> to vector<2x128xbf16>
    %cst_23 = arith.constant dense<0.000000e+00> : vector<2x128xf32>
    %31 = tpu.matmul %30, %28, %cst_23 {dimension_numbers = #tpu.dot_dimension_numbers<[1], [0], [0], [1], [0, 0, 1, 1], [], []>} : vector<2x128xbf16>, vector<128x128xbf16>, vector<2x128xf32> -> vector<2x128xf32>
    %32 = vector.broadcast %29 : vector<1x128xf32> to vector<2x128xf32>
    %33 = arith.addf %31, %32 : vector<2x128xf32>
    %cst_24 = arith.constant 0.000000e+00 : f32
    %34 = vector.broadcast %cst_24 : f32 to vector<2x128xf32>
    %35 = arith.cmpf ogt, %33, %34 : vector<2x128xf32>
    %cst_25 = arith.constant 0.00999999977 : f32
    %36 = vector.broadcast %cst_25 : f32 to vector<2x128xf32>
    %37 = arith.mulf %36, %33 : vector<2x128xf32>
    %38 = arith.select %35, %33, %37 : vector<2x128xi1>, vector<2x128xf32>
    %c0_26 = arith.constant 0 : index
    %c0_27 = arith.constant 0 : index
    %39 = vector.load %arg10[%c0_26, %c0_27] : memref<128x128xbf16, #tpu.memory_space<vmem>>, vector<128x128xbf16>
    %c0_28 = arith.constant 0 : index
    %c0_29 = arith.constant 0 : index
    %40 = vector.load %arg11[%c0_28, %c0_29] : memref<1x128xf32, #tpu.memory_space<vmem>>, vector<1x128xf32>
    %41 = arith.truncf %38 : vector<2x128xf32> to vector<2x128xbf16>
    %cst_30 = arith.constant dense<0.000000e+00> : vector<2x128xf32>
    %42 = tpu.matmul %41, %39, %cst_30 {dimension_numbers = #tpu.dot_dimension_numbers<[1], [0], [0], [1], [0, 0, 1, 1], [], []>} : vector<2x128xbf16>, vector<128x128xbf16>, vector<2x128xf32> -> vector<2x128xf32>
    %43 = vector.broadcast %40 : vector<1x128xf32> to vector<2x128xf32>
    %44 = arith.addf %42, %43 : vector<2x128xf32>
    %cst_31 = arith.constant 0.000000e+00 : f32
    %45 = vector.broadcast %cst_31 : f32 to vector<2x128xf32>
    %46 = arith.cmpf ogt, %44, %45 : vector<2x128xf32>
    %cst_32 = arith.constant 0.00999999977 : f32
    %47 = vector.broadcast %cst_32 : f32 to vector<2x128xf32>
    %48 = arith.mulf %47, %44 : vector<2x128xf32>
    %49 = arith.select %46, %44, %48 : vector<2x128xi1>, vector<2x128xf32>
    %c0_33 = arith.constant 0 : index
    %c0_34 = arith.constant 0 : index
    %50 = vector.load %arg12[%c0_33, %c0_34] : memref<128x1024xbf16, #tpu.memory_space<vmem>>, vector<128x1024xbf16>
    %c0_35 = arith.constant 0 : index
    %c0_36 = arith.constant 0 : index
    %51 = vector.load %arg13[%c0_35, %c0_36] : memref<1x1024xf32, #tpu.memory_space<vmem>>, vector<1x1024xf32>
    %52 = arith.truncf %49 : vector<2x128xf32> to vector<2x128xbf16>
    %cst_37 = arith.constant dense<0.000000e+00> : vector<2x1024xf32>
    %53 = tpu.matmul %52, %50, %cst_37 {dimension_numbers = #tpu.dot_dimension_numbers<[1], [0], [0], [1], [0, 0, 1, 1], [], []>} : vector<2x128xbf16>, vector<128x1024xbf16>, vector<2x1024xf32> -> vector<2x1024xf32>
    %54 = vector.broadcast %51 : vector<1x1024xf32> to vector<2x1024xf32>
    %55 = arith.addf %53, %54 : vector<2x1024xf32>
    %56 = math.tanh %55 : vector<2x1024xf32>
    %57 = arith.extf %0 : vector<2x1024xbf16> to vector<2x1024xf32>
    %58 = arith.subf %56, %57 : vector<2x1024xf32>
    %59 = arith.mulf %58, %58 : vector<2x1024xf32>
    %cst_38 = arith.constant dense<0.000000e+00> : vector<2xf32>
    %60 = vector.multi_reduction <add>, %59, %cst_38 [1] : vector<2x1024xf32> to vector<2xf32>
    %61 = vector.shape_cast %60 : vector<2xf32> to vector<2x1xf32>
    %cst_39 = arith.constant dense<0.000000e+00> : vector<1xf32>
    %62 = vector.multi_reduction <add>, %61, %cst_39 [0] : vector<2x1xf32> to vector<1xf32>
    %63 = vector.shape_cast %62 : vector<1xf32> to vector<1x1xf32>
    %64 = vector.shape_cast %63 : vector<1x1xf32> to vector<1x1xf32>
    %65 = vector.broadcast %64 : vector<1x1xf32> to vector<8x128xf32>
    %c0_40 = arith.constant 0 : index
    %c0_41 = arith.constant 0 : index
    %66 = vector.load %arg14[%c0_40, %c0_41] : memref<8x128xf32, #tpu.memory_space<vmem>>, vector<8x128xf32>
    tpu.vector_store %arg14[%c0_40, %c0_41], %65 {strides = array<i32>} : memref<8x128xf32, #tpu.memory_space<vmem>>, vector<8x128xf32>,
    return
  }
  func.func @transform_0(%arg0: i32) -> (i32, i32) {
    %c0_i32 = arith.constant 0 : i32
    %c0_i32_0 = arith.constant 0 : i32
    return %arg0, %c0_i32 : i32, i32
  }
  func.func @transform_1(%arg0: i32) -> (i32, i32) {
    %c0_i32 = arith.constant 0 : i32
    %c0_i32_0 = arith.constant 0 : i32
    %c0_i32_1 = arith.constant 0 : i32
    return %c0_i32, %c0_i32_0 : i32, i32
  }
  func.func @transform_2(%arg0: i32) -> (i32, i32) {
    %c0_i32 = arith.constant 0 : i32
    %c0_i32_0 = arith.constant 0 : i32
    %c0_i32_1 = arith.constant 0 : i32
    return %c0_i32, %c0_i32_0 : i32, i32
  }
  func.func @transform_3(%arg0: i32) -> (i32, i32) {
    %c0_i32 = arith.constant 0 : i32
    %c0_i32_0 = arith.constant 0 : i32
    %c0_i32_1 = arith.constant 0 : i32
    return %c0_i32, %c0_i32_0 : i32, i32
  }
  func.func @transform_4(%arg0: i32) -> (i32, i32) {
    %c0_i32 = arith.constant 0 : i32
    %c0_i32_0 = arith.constant 0 : i32
    %c0_i32_1 = arith.constant 0 : i32
    return %c0_i32, %c0_i32_0 : i32, i32
  }
  func.func @transform_5(%arg0: i32) -> (i32, i32) {
    %c0_i32 = arith.constant 0 : i32
    %c0_i32_0 = arith.constant 0 : i32
    %c0_i32_1 = arith.constant 0 : i32
    return %c0_i32, %c0_i32_0 : i32, i32
  }
  func.func @transform_6(%arg0: i32) -> (i32, i32) {
    %c0_i32 = arith.constant 0 : i32
    %c0_i32_0 = arith.constant 0 : i32
    %c0_i32_1 = arith.constant 0 : i32
    return %c0_i32, %c0_i32_0 : i32, i32
  }
  func.func @transform_7(%arg0: i32) -> (i32, i32) {
    %c0_i32 = arith.constant 0 : i32
    %c0_i32_0 = arith.constant 0 : i32
    %c0_i32_1 = arith.constant 0 : i32
    return %c0_i32, %c0_i32_0 : i32, i32
  }
  func.func @transform_8(%arg0: i32) -> (i32, i32) {
    %c0_i32 = arith.constant 0 : i32
    %c0_i32_0 = arith.constant 0 : i32
    %c0_i32_1 = arith.constant 0 : i32
    return %c0_i32, %c0_i32_0 : i32, i32
  }
  func.func @transform_9(%arg0: i32) -> (i32, i32) {
    %c0_i32 = arith.constant 0 : i32
    %c0_i32_0 = arith.constant 0 : i32
    %c0_i32_1 = arith.constant 0 : i32
    return %c0_i32, %c0_i32_0 : i32, i32
  }
  func.func @transform_10(%arg0: i32) -> (i32, i32) {
    %c0_i32 = arith.constant 0 : i32
    %c0_i32_0 = arith.constant 0 : i32
    %c0_i32_1 = arith.constant 0 : i32
    return %c0_i32, %c0_i32_0 : i32, i32
  }
  func.func @transform_11(%arg0: i32) -> (i32, i32) {
    %c0_i32 = arith.constant 0 : i32
    %c0_i32_0 = arith.constant 0 : i32
    %c0_i32_1 = arith.constant 0 : i32
    return %c0_i32, %c0_i32_0 : i32, i32
  }
  func.func @transform_12(%arg0: i32) -> (i32, i32) {
    %c0_i32 = arith.constant 0 : i32
    %c0_i32_0 = arith.constant 0 : i32
    %c0_i32_1 = arith.constant 0 : i32
    return %c0_i32, %c0_i32_0 : i32, i32
  }
  func.func @transform_13(%arg0: i32) -> (i32, i32) {
    %c0_i32 = arith.constant 0 : i32
    %c0_i32_0 = arith.constant 0 : i32
    return %arg0, %c0_i32 : i32, i32
  }
}

</mosaic_0001>

<bundles_post_ra>
// kernel: tpu_custom_call.1
= control target key start
LH: loop header
LB: loop body
LE: loop exit
PB: predicated region body
PF: predicated region fallthrough
CT: control target
= control target key end

     0   :  { %18 = vsyncpa [#allocation3], 0  ;;  %s3300_s0 = inlined_call_operand.hbm [shape: bf16[2,1024], index: 0, kind: input, shape index: {}]   ;;  %s3301_s1 = inlined_call_operand.hbm [shape: bf16[1024,128], index: 1, kind: input, shape index: {}]   ;;  %s3302_s2 = inlined_call_operand.hbm [shape: f32[1,128], index: 2, kind: input, shape index: {}]   ;;  %s3303_s3 = inlined_call_operand.hbm [shape: bf16[128,128], index: 3, kind: input, shape index: {}]   ;;  %s3304_s4 = inlined_call_operand.hbm [shape: f32[1,128], index: 4, kind: input, shape index: {}]   ;;  %s3305_s5 = inlined_call_operand.hbm [shape: bf16[128,128], index: 5, kind: input, shape index: {}]   ;;  %s3306_s6 = inlined_call_operand.hbm [shape: f32[1,128], index: 6, kind: input, shape index: {}]   ;;  %s3307_s7 = inlined_call_operand.hbm [shape: bf16[128,128], index: 7, kind: input, shape index: {}]   ;;  %s3308_s8 = inlined_call_operand.hbm [shape: f32[1,128], index: 8, kind: input, shape index: {}]   ;;  %s3309_s9 = inlined_call_operand.hbm [shape: bf16[128,128], index: 9, kind: input, shape index: {}]   ;;  %s3310_s10 = inlined_call_operand.hbm [shape: f32[1,128], index: 10, kind: input, shape index: {}]   ;;  %s3311_s11 = inlined_call_operand.hbm [shape: bf16[128,1024], index: 11, kind: input, shape index: {}]   ;;  %s3312_s12 = inlined_call_operand.hbm [shape: f32[1,1024], index: 12, kind: input, shape index: {}]   ;;  %s3313_s13 = inlined_call_operand.hbm [shape: f32[8,128], index: 13, kind: output, shape index: {}]  }
   0x1   :  { %19 = vsyncpa [#allocation6], 0 }
   0x2   :  { %20 = vsyncpa [#allocation9], 0 }
   0x3   :  { %21 = vsyncpa [#allocation12], 0 }
   0x4   :  { %22 = vsyncpa [#allocation15], 0 }
   0x5   :  { %23 = vsyncpa [#allocation18], 0 }
   0x6   :  { %24 = vsyncpa [#allocation21], 0 }
   0x7   :  { %25 = vsyncpa [#allocation4], 0  ;;  %s2944_s25 = smov [#allocation5]   ;;  %s2620_s29 = scalar_lea.hbm %s3301_s1, 8192 }
   0x8   :  { %s41_s26 = sshll.u32 %s2944_s25, 4  ;;  %p2621_p0 = scmp.ne.s32.totalorder %s3301_s1, %s2620_s29  ;;  %s42_s26 = int_to_ptr.vmem [resolvable:$true] %s41_s26 }
   0x9   :  { %p2624_p1 = scmp.lt.u32.totalorder %s2620_s29, %s3301_s1 }
   0xb   :  { %p2626_p2 = pnand %p2624_p1, %p2621_p0 }
   0xd   :  { %2629 = shalt.err (!%p2626_p2)
}
   0xe   :  { %s2630_s17 = scalar_lea.vmem %s42_s26, 8192  ;;  %p2635_p4 = scmp.lt.s32.totalorder %s42_s26, %s42_s26 }
   0xf   :  { %p2631_p3 = scmp.ne.s32.totalorder %s42_s26, %s2630_s17  ;;  %p2636_p5 = scmp.lt.s32.totalorder %s2630_s17, %s2630_s17 }
  0x11   :  { %p2637_p6 = por %p2636_p5, %p2635_p4 }
  0x13   :  { %p2638_p7 = pnand %p2637_p6, %p2631_p3 }
  0x15   :  { %2641 = shalt.err (!%p2638_p7)
}
  0x16   :  { %s2945_s18 = smov 64   ;;  %s2946_s19 = smov 4  }
  0x17   :  { %47 = dma.hbm_to_vmem [thread:$0]  %s3301_s1, 8192, %s42_s26, [#allocation6], %s2945_s18, %s2945_s18, %s2946_s19  }
  0x18   :  { %s2947_s22 = smov [#allocation8]   ;;  %s2948_s24 = smov [#allocation11]  }
  0x19   :  { %s63_s23 = sshll.u32 %s2947_s22, 4  ;;  %s85_s25 = sshll.u32 %s2948_s24, 4  ;;  %s64_s23 = int_to_ptr.vmem [resolvable:$true] %s63_s23  ;;  %s86_s25 = int_to_ptr.vmem [resolvable:$true] %s85_s25 }
  0x1a   :  { %s2642_s29 = scalar_lea.hbm %s3303_s3, 1024 }
  0x1b   :  { %p2643_p8 = scmp.ne.s32.totalorder %s3303_s3, %s2642_s29  ;;  %p2646_p9 = scmp.lt.u32.totalorder %s2642_s29, %s3303_s3 }
  0x1d   :  { %p2648_p10 = pnand %p2646_p9, %p2643_p8 }
  0x1f   :  { %2651 = shalt.err (!%p2648_p10)
}
  0x20   :  { %s2652_s1 = scalar_lea.vmem %s64_s23, 1024  ;;  %p2657_p12 = scmp.lt.s32.totalorder %s64_s23, %s64_s23 }
  0x21   :  { %p2653_p11 = scmp.ne.s32.totalorder %s64_s23, %s2652_s1  ;;  %p2658_p13 = scmp.lt.s32.totalorder %s2652_s1, %s2652_s1 }
  0x23   :  { %p2659_p0 = por %p2658_p13, %p2657_p12 }
  0x25   :  { %p2660_p1 = pnand %p2659_p0, %p2653_p11 }
  0x27   :  { %2663 = shalt.err (!%p2660_p1)
}
  0x28   :  { %69 = dma.hbm_to_vmem [thread:$0]  %s3303_s3, 1024, %s64_s23, [#allocation9], %s2945_s18, %s2945_s18, %s2946_s19  }
  0x29   :  { %s2664_s22 = scalar_lea.hbm %s3305_s5, 1024 }
  0x2a   :  { %p2665_p2 = scmp.ne.s32.totalorder %s3305_s5, %s2664_s22  ;;  %p2668_p3 = scmp.lt.u32.totalorder %s2664_s22, %s3305_s5 }
  0x2c   :  { %p2670_p4 = pnand %p2668_p3, %p2665_p2 }
  0x2e   :  { %2673 = shalt.err (!%p2670_p4)
}
  0x2f   :  { %s2674_s30 = scalar_lea.vmem %s86_s25, 1024  ;;  %p2679_p6 = scmp.lt.s32.totalorder %s86_s25, %s86_s25 }
  0x30   :  { %p2675_p5 = scmp.ne.s32.totalorder %s86_s25, %s2674_s30  ;;  %p2680_p7 = scmp.lt.s32.totalorder %s2674_s30, %s2674_s30 }
  0x32   :  { %p2681_p8 = por %p2680_p7, %p2679_p6 }
  0x34   :  { %p2682_p9 = pnand %p2681_p8, %p2675_p5 }
  0x36   :  { %2685 = shalt.err (!%p2682_p9)
}
  0x37   :  { %91 = dma.hbm_to_vmem [thread:$0]  %s3305_s5, 1024, %s86_s25, [#allocation12], %s2945_s18, %s2945_s18, %s2946_s19  }
  0x38   :  { %s2949_s14 = smov [#allocation14]   ;;  %s2950_s16 = smov [#allocation17]  }
  0x39   :  { %s107_s15 = sshll.u32 %s2949_s14, 4  ;;  %s129_s1 = sshll.u32 %s2950_s16, 4  ;;  %s108_s15 = int_to_ptr.vmem [resolvable:$true] %s107_s15  ;;  %s130_s1 = int_to_ptr.vmem [resolvable:$true] %s129_s1 }
  0x3a   :  { %s2686_s20 = scalar_lea.hbm %s3307_s7, 1024 }
  0x3b   :  { %p2687_p10 = scmp.ne.s32.totalorder %s3307_s7, %s2686_s20  ;;  %p2690_p11 = scmp.lt.u32.totalorder %s2686_s20, %s3307_s7 }
  0x3d   :  { %p2692_p12 = pnand %p2690_p11, %p2687_p10 }
  0x3f   :  { %2695 = shalt.err (!%p2692_p12)
}
  0x40   :  { %s2696_s5 = scalar_lea.vmem %s108_s15, 1024  ;;  %p2701_p0 = scmp.lt.s32.totalorder %s108_s15, %s108_s15 }
  0x41   :  { %p2697_p13 = scmp.ne.s32.totalorder %s108_s15, %s2696_s5  ;;  %p2702_p1 = scmp.lt.s32.totalorder %s2696_s5, %s2696_s5 }
  0x43   :  { %p2703_p2 = por %p2702_p1, %p2701_p0 }
  0x45   :  { %p2704_p3 = pnand %p2703_p2, %p2697_p13 }
  0x47   :  { %2707 = shalt.err (!%p2704_p3)
}
  0x48   :  { %113 = dma.hbm_to_vmem [thread:$0]  %s3307_s7, 1024, %s108_s15, [#allocation15], %s2945_s18, %s2945_s18, %s2946_s19  }
  0x49   :  { %s2708_s3 = scalar_lea.hbm %s3309_s9, 1024 }
  0x4a   :  { %p2709_p4 = scmp.ne.s32.totalorder %s3309_s9, %s2708_s3  ;;  %p2712_p5 = scmp.lt.u32.totalorder %s2708_s3, %s3309_s9 }
  0x4c   :  { %p2714_p6 = pnand %p2712_p5, %p2709_p4 }
  0x4e   :  { %2717 = shalt.err (!%p2714_p6)
}
  0x4f   :  { %s2718_s17 = scalar_lea.vmem %s130_s1, 1024  ;;  %p2723_p8 = scmp.lt.s32.totalorder %s130_s1, %s130_s1 }
  0x50   :  { %p2719_p7 = scmp.ne.s32.totalorder %s130_s1, %s2718_s17  ;;  %p2724_p9 = scmp.lt.s32.totalorder %s2718_s17, %s2718_s17 }
  0x52   :  { %p2725_p10 = por %p2724_p9, %p2723_p8 }
  0x54   :  { %p2726_p11 = pnand %p2725_p10, %p2719_p7 }
  0x56   :  { %2729 = shalt.err (!%p2726_p11)
}
  0x57   :  { %135 = dma.hbm_to_vmem [thread:$0]  %s3309_s9, 1024, %s130_s1, [#allocation18], %s2945_s18, %s2945_s18, %s2946_s19  }
  0x58   :  { %s2951_s20 = smov [#allocation20]   ;;  %s2730_s27 = scalar_lea.hbm %s3311_s11, 8192 }
  0x59   :  { %s151_s21 = sshll.u32 %s2951_s20, 4  ;;  %p2731_p12 = scmp.ne.s32.totalorder %s3311_s11, %s2730_s27  ;;  %s152_s21 = int_to_ptr.vmem [resolvable:$true] %s151_s21 }
  0x5a   :  { %p2734_p13 = scmp.lt.u32.totalorder %s2730_s27, %s3311_s11 }
  0x5c   :  { %p2736_p0 = pnand %p2734_p13, %p2731_p12 }
  0x5e   :  { %2739 = shalt.err (!%p2736_p0)
}
  0x5f   :  { %s2740_s30 = scalar_lea.vmem %s152_s21, 8192  ;;  %p2745_p2 = scmp.lt.s32.totalorder %s152_s21, %s152_s21 }
  0x60   :  { %p2741_p1 = scmp.ne.s32.totalorder %s152_s21, %s2740_s30  ;;  %p2746_p3 = scmp.lt.s32.totalorder %s2740_s30, %s2740_s30 }
  0x62   :  { %p2747_p4 = por %p2746_p3, %p2745_p2 }
  0x64   :  { %p2748_p5 = pnand %p2747_p4, %p2741_p1 }
  0x66   :  { %2751 = shalt.err (!%p2748_p5)
}
  0x67   :  { %s2952_s9 = smov 512   ;;  %s2953_s18 = smov 32  }
  0x68   :  { %157 = dma.hbm_to_vmem [thread:$0]  %s3311_s11, 8192, %s152_s21, [#allocation21], %s2952_s9, %s2952_s9, %s2953_s18  }
  0x69   :  { %s2954_s3 = smov [#allocation2]   ;;  %s2955_s14 = smov [#allocation7]  }
  0x6a   :  { %s32_s23 = sshll.u32 %s2954_s3, 4  ;;  %s54_s16 = sshll.u32 %s2955_s14, 4  ;;  %s33_s23 = int_to_ptr.vmem [resolvable:$true] %s32_s23  ;;  %s55_s16 = int_to_ptr.vmem [resolvable:$true] %s54_s16 }
  0x6b   :  { %s2752_s7 = scalar_lea.hbm %s3300_s0, 128 }
  0x6c   :  { %p2753_p6 = scmp.ne.s32.totalorder %s3300_s0, %s2752_s7  ;;  %p2756_p7 = scmp.lt.u32.totalorder %s2752_s7, %s3300_s0 }
  0x6e   :  { %p2758_p8 = pnand %p2756_p7, %p2753_p6 }
  0x70   :  { %2761 = shalt.err (!%p2758_p8)
}
  0x71   :  { %s2762_s11 = scalar_lea.vmem %s33_s23, 128  ;;  %p2767_p10 = scmp.lt.s32.totalorder %s33_s23, %s33_s23 }
  0x72   :  { %p2763_p9 = scmp.ne.s32.totalorder %s33_s23, %s2762_s11  ;;  %p2768_p11 = scmp.lt.s32.totalorder %s2762_s11, %s2762_s11 }
  0x74   :  { %p2769_p12 = por %p2768_p11, %p2767_p10 }
  0x76   :  { %p2770_p13 = pnand %p2769_p12, %p2763_p9 }
  0x78   :  { %2773 = shalt.err (!%p2770_p13)
}
  0x79   :  { %35 = dma.hbm_to_vmem [thread:$0]  %s3300_s0, 128, %s33_s23, [#allocation3]  }
  0x7a   :  { %s2774_s28 = scalar_lea.hbm %s3302_s2, 16 }
  0x7b   :  { %p2775_p0 = scmp.ne.s32.totalorder %s3302_s2, %s2774_s28  ;;  %p2778_p1 = scmp.lt.u32.totalorder %s2774_s28, %s3302_s2 }
  0x7d   :  { %p2780_p2 = pnand %p2778_p1, %p2775_p0 }
  0x7f   :  { %2783 = shalt.err (!%p2780_p2)
}
  0x80   :  { %s2784_s19 = scalar_lea.vmem %s55_s16, 16  ;;  %s2788_s1 = scalar_lea.vmem %s55_s16, 32 }
  0x81   :  { %p2785_p3 = scmp.ne.s32.totalorder %s55_s16, %s2784_s19  ;;  %p2789_p4 = scmp.lt.s32.totalorder %s55_s16, %s55_s16 }
  0x82   :  { %p2790_p5 = scmp.lt.s32.totalorder %s2788_s1, %s2784_s19 }
  0x84   :  { %p2791_p6 = por %p2790_p5, %p2789_p4 }
  0x86   :  { %p2792_p7 = pnand %p2791_p6, %p2785_p3 }
  0x88   :  { %2795 = shalt.err (!%p2792_p7)
}
  0x89   :  { %57 = dma.hbm_to_vmem [thread:$0]  %s3302_s2, 16, %s55_s16, [#allocation6]  }
  0x8a   :  { %s2956_s23 = smov [#allocation10]   ;;  %s2957_s26 = smov [#allocation13]  }
  0x8b   :  { %s76_s14 = sshll.u32 %s2956_s23, 4  ;;  %s98_s17 = sshll.u32 %s2957_s26, 4  ;;  %s77_s14 = int_to_ptr.vmem [resolvable:$true] %s76_s14  ;;  %s99_s17 = int_to_ptr.vmem [resolvable:$true] %s98_s17 }
  0x8c   :  { %s2796_s20 = scalar_lea.hbm %s3304_s4, 16 }
  0x8d   :  { %p2797_p8 = scmp.ne.s32.totalorder %s3304_s4, %s2796_s20  ;;  %p2800_p9 = scmp.lt.u32.totalorder %s2796_s20, %s3304_s4 }
  0x8f   :  { %p2802_p10 = pnand %p2800_p9, %p2797_p8 }
  0x91   :  { %2805 = shalt.err (!%p2802_p10)
}
  0x92   :  { %s2806_s2 = scalar_lea.vmem %s77_s14, 16  ;;  %s2810_s16 = scalar_lea.vmem %s77_s14, 32 }
  0x93   :  { %p2807_p11 = scmp.ne.s32.totalorder %s77_s14, %s2806_s2  ;;  %p2811_p12 = scmp.lt.s32.totalorder %s77_s14, %s77_s14 }
  0x94   :  { %p2812_p13 = scmp.lt.s32.totalorder %s2810_s16, %s2806_s2 }
  0x96   :  { %p2813_p0 = por %p2812_p13, %p2811_p12 }
  0x98   :  { %p2814_p1 = pnand %p2813_p0, %p2807_p11 }
  0x9a   :  { %2817 = shalt.err (!%p2814_p1)
}
  0x9b   :  { %79 = dma.hbm_to_vmem [thread:$0]  %s3304_s4, 16, %s77_s14, [#allocation9]  }
  0x9c   :  { %s2818_s29 = scalar_lea.hbm %s3306_s6, 16 }
  0x9d   :  { %p2819_p2 = scmp.ne.s32.totalorder %s3306_s6, %s2818_s29  ;;  %p2822_p3 = scmp.lt.u32.totalorder %s2818_s29, %s3306_s6 }
  0x9f   :  { %p2824_p4 = pnand %p2822_p3, %p2819_p2 }
  0xa1   :  { %2827 = shalt.err (!%p2824_p4)
}
  0xa2   :  { %s2828_s1 = scalar_lea.vmem %s99_s17, 16  ;;  %s2832_s0 = scalar_lea.vmem %s99_s17, 32 }
  0xa3   :  { %p2829_p5 = scmp.ne.s32.totalorder %s99_s17, %s2828_s1  ;;  %p2833_p6 = scmp.lt.s32.totalorder %s99_s17, %s99_s17 }
  0xa4   :  { %p2834_p7 = scmp.lt.s32.totalorder %s2832_s0, %s2828_s1 }
  0xa6   :  { %p2835_p8 = por %p2834_p7, %p2833_p6 }
  0xa8   :  { %p2836_p9 = pnand %p2835_p8, %p2829_p5 }
  0xaa   :  { %2839 = shalt.err (!%p2836_p9)
}
  0xab   :  { %101 = dma.hbm_to_vmem [thread:$0]  %s3306_s6, 16, %s99_s17, [#allocation12]  }
  0xac   :  { %s2958_s23 = smov [#allocation16]   ;;  %s2959_s26 = smov [#allocation19]  }
  0xad   :  { %s120_s14 = sshll.u32 %s2958_s23, 4  ;;  %s142_s7 = sshll.u32 %s2959_s26, 4  ;;  %s121_s14 = int_to_ptr.vmem [resolvable:$true] %s120_s14  ;;  %s143_s7 = int_to_ptr.vmem [resolvable:$true] %s142_s7 }
  0xae   :  { %s2840_s22 = scalar_lea.hbm %s3308_s8, 16 }
  0xaf   :  { %p2841_p10 = scmp.ne.s32.totalorder %s3308_s8, %s2840_s22  ;;  %p2844_p11 = scmp.lt.u32.totalorder %s2840_s22, %s3308_s8 }
  0xb1   :  { %p2846_p12 = pnand %p2844_p11, %p2841_p10 }
  0xb3   :  { %2849 = shalt.err (!%p2846_p12)
}
  0xb4   :  { %s2850_s6 = scalar_lea.vmem %s121_s14, 16  ;;  %s2854_s17 = scalar_lea.vmem %s121_s14, 32 }
  0xb5   :  { %p2851_p13 = scmp.ne.s32.totalorder %s121_s14, %s2850_s6  ;;  %p2855_p0 = scmp.lt.s32.totalorder %s121_s14, %s121_s14 }
  0xb6   :  { %p2856_p1 = scmp.lt.s32.totalorder %s2854_s17, %s2850_s6 }
  0xb8   :  { %p2857_p2 = por %p2856_p1, %p2855_p0 }
  0xba   :  { %p2858_p3 = pnand %p2857_p2, %p2851_p13 }
  0xbc   :  { %2861 = shalt.err (!%p2858_p3)
}
  0xbd   :  { %123 = dma.hbm_to_vmem [thread:$0]  %s3308_s8, 16, %s121_s14, [#allocation15]  }
  0xbe   :  { %s2862_s28 = scalar_lea.hbm %s3310_s10, 16 }
  0xbf   :  { %p2863_p4 = scmp.ne.s32.totalorder %s3310_s10, %s2862_s28  ;;  %p2866_p5 = scmp.lt.u32.totalorder %s2862_s28, %s3310_s10 }
  0xc1   :  { %p2868_p6 = pnand %p2866_p5, %p2863_p4 }
  0xc3   :  { %2871 = shalt.err (!%p2868_p6)
}
  0xc4   :  { %s2872_s19 = scalar_lea.vmem %s143_s7, 16  ;;  %s2876_s1 = scalar_lea.vmem %s143_s7, 32 }
  0xc5   :  { %p2873_p7 = scmp.ne.s32.totalorder %s143_s7, %s2872_s19  ;;  %p2877_p8 = scmp.lt.s32.totalorder %s143_s7, %s143_s7 }
  0xc6   :  { %p2878_p9 = scmp.lt.s32.totalorder %s2876_s1, %s2872_s19 }
  0xc8   :  { %p2879_p10 = por %p2878_p9, %p2877_p8 }
  0xca   :  { %p2880_p11 = pnand %p2879_p10, %p2873_p7 }
  0xcc   :  { %2883 = shalt.err (!%p2880_p11)
}
  0xcd   :  { %145 = dma.hbm_to_vmem [thread:$0]  %s3310_s10, 16, %s143_s7, [#allocation18]  }
  0xce   :  { %s2960_s4 = smov [#allocation22]   ;;  %s2884_s26 = scalar_lea.hbm %s3312_s12, 128 }
  0xcf   :  { %s164_s3 = sshll.u32 %s2960_s4, 4  ;;  %p2885_p12 = scmp.ne.s32.totalorder %s3312_s12, %s2884_s26  ;;  %s165_s3 = int_to_ptr.vmem [resolvable:$true] %s164_s3 }
  0xd0   :  { %p2888_p13 = scmp.lt.u32.totalorder %s2884_s26, %s3312_s12 }
  0xd2   :  { %p2890_p0 = pnand %p2888_p13, %p2885_p12 }
  0xd4   :  { %2893 = shalt.err (!%p2890_p0)
}
  0xd5   :  { %s2894_s11 = scalar_lea.vmem %s165_s3, 128  ;;  %p2899_p2 = scmp.lt.s32.totalorder %s165_s3, %s165_s3 }
  0xd6   :  { %p2895_p1 = scmp.ne.s32.totalorder %s165_s3, %s2894_s11  ;;  %p2900_p3 = scmp.lt.s32.totalorder %s2894_s11, %s2894_s11 }
  0xd8   :  { %p2901_p4 = por %p2900_p3, %p2899_p2 }
  0xda   :  { %p2902_p5 = pnand %p2901_p4, %p2895_p1 }
  0xdc   :  { %2905 = shalt.err (!%p2902_p5)
}
  0xdd   :  { %167 = dma.hbm_to_vmem [thread:$0]  %s3312_s12, 128, %s165_s3, [#allocation21]  }
  0xde   :  { %2928 = dma.done.wait [#allocation3], 128  }
  0xdf   :  { %2929 = vsyncadd [#allocation3], 4294967168 }
  0xe0   :  { %2930 = dma.done.wait [#allocation6], 8208  }
  0xe1   :  { %2931 = vsyncadd [#allocation6], 4294959088 }
  0xe2   :  { %2932 = dma.done.wait [#allocation9], 1040  }
  0xe3   :  { %2933 = vsyncadd [#allocation9], 4294966256 }
  0xe4   :  { %2934 = dma.done.wait [#allocation12], 1040  }
  0xe5   :  { %2935 = vsyncadd [#allocation12], 4294966256 }
  0xe6   :  { %2936 = dma.done.wait [#allocation15], 1040  }
  0xe7   :  { %2937 = vsyncadd [#allocation15], 4294966256 }
  0xe8   :  { %2938 = dma.done.wait [#allocation18], 1040  }
  0xe9   :  { %2939 = vsyncadd [#allocation18], 4294966256 }
  0xea   :  { %2940 = dma.done.wait [#allocation21], 8320  }
  0xeb   :  { %2941 = vsyncadd [#allocation21], 4294958976  ;;  %v2506_v0 = vld [vmem:[#allocation5 + $0x40] sm:$0xff]   ;;  %v2510_v4 = vld [vmem:[#allocation5 + $0x48] sm:$0xff]   ;;  %v2961_v22 = vmov 1966171168   ;;  %v349_v24 = vlaneseq }
  0xec   :  { %v2507_v1 = vld [vmem:[#allocation5 + $0xc0] sm:$0xff]   ;;  %2279 = vmatprep.subr.bf16.mxu0 %v2506_v0  ;;  %v2511_v5 = vld [vmem:[#allocation5 + $0xc8] sm:$0xff]   ;;  %v2514_v8 = vld [vmem:[#allocation5 + $0x50] sm:$0xff]   ;;  %v347_v23 = vunpack.c.l.s4 %v2961_v22  ;;  %vm2963_vm0 = vmmov 0   ;;  %vm2067_vm5 = vcmask 1041408   ;;  %s2966_s12 = smov [#allocation23]  }
  0xed   :  { %v2508_v2 = vld [vmem:[#allocation5] sm:$0xff]   ;;  %2301 = vmatprep.subr.bf16.mxu1 %v2507_v1  ;;  %v2512_v6 = vld [vmem:[#allocation5 + $0x8] sm:$0xff]   ;;  %v2515_v9 = vld [vmem:[#allocation5 + $0xd0] sm:$0xff]   ;;  %v3208_v30 = vshrl.u32 %v349_v24, 7  ;;  %s2099_s21 = sshll.u32 %s2966_s12, 4  ;;  %s2100_s21 = int_to_ptr.vmem [resolvable:$true] %s2099_s21 }
  0xee   :  { %v2509_v3 = vld [vmem:[#allocation5 + $0x80] sm:$0xff]   ;;  %2280 = vmatpush3.bf16.msra.mxu0 %v2508_v2  ;;  %v2513_v7 = vld [vmem:[#allocation5 + $0x88] sm:$0xff]   ;;  %v2516_v10 = vld [vmem:[#allocation5 + $0x10] sm:$0xff]   ;;  %v348_v29 = vunpack.c.0.s8 %v347_v23  ;;  %s2906_s2 = scalar_lea.vmem %s2100_s21, 128  ;;  %p2911_p7 = scmp.lt.s32.totalorder %s2100_s21, %s2100_s21 }
  0xef   :  { %2302 = vmatpush3.bf16.msra.mxu1 %v2509_v3  ;;  %2281 = vmatprep.subr.bf16.mxu0 %v2510_v4  ;;  %v2517_v11 = vld [vmem:[#allocation5 + $0x90] sm:$0xff]   ;;  %v2518_v12 = vld [vmem:[#allocation5 + $0x58] sm:$0xff]   ;;  %v2522_v16 = vld [vmem:[#allocation5 + $0x60] sm:$0xff]   ;;  %p2907_p6 = scmp.ne.s32.totalorder %s2100_s21, %s2906_s2  ;;  %p2912_p8 = scmp.lt.s32.totalorder %s2906_s2, %s2906_s2 }
  0xf0   :  { %2303 = vmatprep.subr.bf16.mxu1 %v2511_v5  ;;  %v2519_v13 = vld [vmem:[#allocation5 + $0xd8] sm:$0xff]   ;;  %v2523_v17 = vld [vmem:[#allocation5 + $0xe0] sm:$0xff]   ;;  %v2526_v20 = vld [vmem:[#allocation5 + $0x68] sm:$0xff]   ;;  %v3211_v35 = vsub.s32 %v348_v29, %v3208_v30 }
  0xf1   :  { %v2520_v14 = vld [vmem:[#allocation5 + $0x18] sm:$0xff]   ;;  %v2524_v18 = vld [vmem:[#allocation5 + $0x20] sm:$0xff]   ;;  %v2527_v21 = vld [vmem:[#allocation5 + $0xe8] sm:$0xff]   ;;  %p2913_p9 = por %p2912_p8, %p2911_p7 }
  0xf2   :  { %2282 = vmatpush3.bf16.msra.mxu0 %v2512_v6  ;;  %v2521_v15 = vld [vmem:[#allocation5 + $0x98] sm:$0xff]   ;;  %v2525_v19 = vld [vmem:[#allocation5 + $0xa0] sm:$0xff]   ;;  %v2528_v25 = vld [vmem:[#allocation5 + $0x28] sm:$0xff]  }
  0xf3   :  { %2304 = vmatpush3.bf16.msra.mxu1 %v2513_v7  ;;  %2283 = vmatprep.subr.bf16.mxu0 %v2514_v8  ;;  %v2529_v26 = vld [vmem:[#allocation5 + $0xa8] sm:$0xff]   ;;  %v2530_v27 = vld [vmem:[#allocation5 + $0x70] sm:$0xff]   ;;  %v2534_v33 = vld [vmem:[#allocation5 + $0x78] sm:$0xff]   ;;  %p2914_p10 = pnand %p2913_p9, %p2907_p6 }
  0xf4   :  { %2305 = vmatprep.subr.bf16.mxu1 %v2515_v9  ;;  %v2531_v28 = vld [vmem:[#allocation5 + $0xf0] sm:$0xff]   ;;  %v2535_v34 = vld [vmem:[#allocation5 + $0xf8] sm:$0xff]   ;;  %v2538_v40 = vld [vmem:[#allocation5 + $0x140] sm:$0xff]  }
  0xf5   :  { %v2532_v31 = vld [vmem:[#allocation5 + $0x30] sm:$0xff]   ;;  %v2536_v36 = vld [vmem:[#allocation5 + $0x38] sm:$0xff]   ;;  %v2539_v42 = vld [vmem:[#allocation5 + $0x1c0] sm:$0xff]  }
  0xf6   :  { %2284 = vmatpush3.bf16.msra.mxu0 %v2516_v10  ;;  %v2533_v32 = vld [vmem:[#allocation5 + $0xb0] sm:$0xff]   ;;  %v2537_v37 = vld [vmem:[#allocation5 + $0xb8] sm:$0xff]   ;;  %v2540_v46 = vld [vmem:[#allocation5 + $0x100] sm:$0xff]  }
  0xf7   :  { %2306 = vmatpush3.bf16.msra.mxu1 %v2517_v11  ;;  %2285 = vmatprep.subr.bf16.mxu0 %v2518_v12  ;;  %v208_v38 = vld [vmem:[#allocation2] sm:$0xff]  ;;  %v2541_v48 = vld [vmem:[#allocation5 + $0x180] sm:$0xff]   ;;  %v2542_v51 = vld [vmem:[#allocation5 + $0x148] sm:$0xff]  }
  0xf8   :  { %2307 = vmatprep.subr.bf16.mxu1 %v2519_v13  ;;  %v352_v39 = vrot.slane %v208_v38, %v3211_v35  ;;  %v345_v41 = vcombine.high %v208_v38, %v208_v38  ;;  %v2543_v53 = vld [vmem:[#allocation5 + $0x1c8] sm:$0xff]   ;;  %v2546_v58 = vld [vmem:[#allocation5 + $0x150] sm:$0xff]   ;;  %v2550_v62 = vld [vmem:[#allocation5 + $0x158] sm:$0xff]  }
  0xf9   :  { %v2544_v55 = vld [vmem:[#allocation5 + $0x108] sm:$0xff]   ;;  %v2547_v59 = vld [vmem:[#allocation5 + $0x1d0] sm:$0xff]   ;;  %v2551_v63 = vld [vmem:[#allocation5 + $0x1d8] sm:$0xff]  }
  0xfa   :  { %2286 = vmatpush3.bf16.msra.mxu0 %v2520_v14  ;;  %v360_v43 = vcombine.high %v352_v39, %v352_v39  ;;  %v368_v44 = vrot.slane %v352_v39, %v3211_v35  ;;  %v3216_v45 = vrot.slane %v345_v41, %v3211_v35  ;;  %v2545_v56 = vld [vmem:[#allocation5 + $0x188] sm:$0xff]   ;;  %v2548_v60 = vld [vmem:[#allocation5 + $0x110] sm:$0xff]   ;;  %v2552_v0 = vld [vmem:[#allocation5 + $0x118] sm:$0xff]  }
  0xfb   :  { %2308 = vmatpush3.bf16.msra.mxu1 %v2521_v15  ;;  %2287 = vmatprep.subr.bf16.mxu0 %v2522_v16  ;;  %v2549_v61 = vld [vmem:[#allocation5 + $0x190] sm:$0xff]   ;;  %v2553_v1 = vld [vmem:[#allocation5 + $0x198] sm:$0xff]   ;;  %v2554_v2 = vld [vmem:[#allocation5 + $0x160] sm:$0xff]  }
  0xfc   :  { %2309 = vmatprep.subr.bf16.mxu1 %v2523_v17  ;;  %v382_v47 = vrot.slane %v360_v43, %v3211_v35  ;;  %v361_v49 = vcombine.high %v3216_v45, %v3216_v45  ;;  %v390_v50 = vcombine.high %v368_v44, %v368_v44  ;;  %v2555_v3 = vld [vmem:[#allocation5 + $0x1e0] sm:$0xff]   ;;  %v2558_v6 = vld [vmem:[#allocation5 + $0x168] sm:$0xff]   ;;  %v2562_v10 = vld [vmem:[#allocation5 + $0x170] sm:$0xff]  }
  0xfd   :  { %v2556_v4 = vld [vmem:[#allocation5 + $0x120] sm:$0xff]   ;;  %v2559_v7 = vld [vmem:[#allocation5 + $0x1e8] sm:$0xff]   ;;  %v2563_v11 = vld [vmem:[#allocation5 + $0x1f0] sm:$0xff]  }
  0xfe   :  { %2288 = vmatpush3.bf16.msra.mxu0 %v2524_v18  ;;  %818 = vmatprep.mubr.bf16.mxu0 %v382_v47  ;;  %v392_v52 = vcombine.high %v382_v47, %v382_v47  ;;  %v389_v54 = vrot.slane %v361_v49, %v3211_v35  ;;  %v2557_v5 = vld [vmem:[#allocation5 + $0x1a0] sm:$0xff]   ;;  %v2560_v8 = vld [vmem:[#allocation5 + $0x128] sm:$0xff]   ;;  %v2564_v12 = vld [vmem:[#allocation5 + $0x130] sm:$0xff]   ;;  %v375_v18 = vrot.slane %v3216_v45, %v3211_v35 }
  0xff   :  { %2310 = vmatpush3.bf16.msra.mxu1 %v2525_v19  ;;  %2289 = vmatprep.subr.bf16.mxu0 %v2526_v20  ;;  %v2561_v9 = vld [vmem:[#allocation5 + $0x1a8] sm:$0xff]   ;;  %v2565_v13 = vld [vmem:[#allocation5 + $0x1b0] sm:$0xff]   ;;  %v2566_v14 = vld [vmem:[#allocation5 + $0x178] sm:$0xff]  }
 0x100   :  { %2311 = vmatprep.subr.bf16.mxu1 %v2527_v21  ;;  %858 = vmatprep.mubr.bf16.mxu1 %v392_v52  ;;  %v393_v57 = vcombine.high %v389_v54, %v389_v54  ;;  %v2567_v15 = vld [vmem:[#allocation5 + $0x1f8] sm:$0xff]   ;;  %v391_v19 = vcombine.high %v375_v18, %v375_v18  ;;  %v2571_v20 = vld [vmem:[#allocation8] sm:$0xff]   ;;  %v2962_v21 = vmov 0.0   ;;  %v2572_v22 = vld [vmem:[#allocation8 + $0x8] sm:$0xff]  }
 0x101   :  { %v2568_v16 = vld [vmem:[#allocation5 + $0x138] sm:$0xff]   ;;  %v2579_v29 = vld [vmem:[#allocation11] sm:$0xff]   ;;  %v2584_v35 = vld [vmem:[#allocation11 + $0x28] sm:$0xff]  }
 0x102   :  { %2290 = vmatpush3.bf16.msra.mxu0 %v2528_v25  ;;  %v2569_v17 = vld [vmem:[#allocation5 + $0x1b8] sm:$0xff]   ;;  %v2575_v25 = vld [vmem:[#allocation8 + $0x20] sm:$0xff]  }
 0x103   :  { %2312 = vmatpush3.bf16.msra.mxu1 %v2529_v26  ;;  %2291 = vmatprep.subr.bf16.mxu0 %v2530_v27  ;;  %v2573_v23 = vld [vmem:[#allocation8 + $0x10] sm:$0xff]   ;;  %v2574_v24 = vld [vmem:[#allocation8 + $0x18] sm:$0xff]   ;;  %v2576_v26 = vld [vmem:[#allocation8 + $0x28] sm:$0xff]  }
 0x104   :  { %2313 = vmatprep.subr.bf16.mxu1 %v2531_v28  ;;  %v2577_v27 = vld [vmem:[#allocation8 + $0x30] sm:$0xff]   ;;  %v2578_v28 = vld [vmem:[#allocation8 + $0x38] sm:$0xff]  }
 0x106   :  { %2292 = vmatpush3.bf16.msra.mxu0 %v2532_v31  ;;  %v2580_v31 = vld [vmem:[#allocation11 + $0x8] sm:$0xff]  }
 0x107   :  { %2314 = vmatpush3.bf16.msra.mxu1 %v2533_v32  ;;  %2293 = vmatprep.subr.bf16.mxu0 %v2534_v33  ;;  %v2581_v32 = vld [vmem:[#allocation11 + $0x10] sm:$0xff]   ;;  %v2582_v33 = vld [vmem:[#allocation11 + $0x18] sm:$0xff]  }
 0x108   :  { %2315 = vmatprep.subr.bf16.mxu1 %v2535_v34  ;;  %v2583_v34 = vld [vmem:[#allocation11 + $0x20] sm:$0xff]  }
 0x10a   :  { %2294 = vmatpush3.bf16.msra.mxu0 %v2536_v36 }
 0x10b   :  { %2316 = vmatpush3.bf16.msra.mxu1 %v2537_v37  ;;  %2323 = vmatprep.subr.bf16.mxu0 %v2538_v40  ;;  %v2114_v37 = vld [vmem:[#allocation7] ss:$0 sm:$0xff] }
 0x10c   :  { %2345 = vmatprep.subr.bf16.mxu1 %v2539_v42 }
 0x10d   :  { %819 = vmatmul.mubr.bf16.vlgmr.msra.gmra.mrb[0].mxu0 %v368_v44 }
 0x10e   :  { %2324 = vmatpush3.bf16.msra.mxu0 %v2540_v46  ;;  %859 = vmatmul.mubr.bf16.vlgmr.msra.gmra.mrb[0].mxu1 %v390_v50 }
 0x10f   :  { %2325 = vmatprep.subr.bf16.mxu0 %v2542_v51  ;;  %2346 = vmatpush3.bf16.msra.mxu1 %v2541_v48 }
 0x110   :  { %898 = vmatprep.mubr.bf16.mxu0 %v389_v54  ;;  %2347 = vmatprep.subr.bf16.mxu1 %v2543_v53 }
 0x111   :  { %938 = vmatprep.mubr.bf16.mxu1 %v393_v57 }
 0x112   :  { %2326 = vmatpush3.bf16.msra.mxu0 %v2544_v55 }
 0x113   :  { %2327 = vmatprep.subr.bf16.mxu0 %v2546_v58  ;;  %2348 = vmatpush3.bf16.msra.mxu1 %v2545_v56 }
 0x114   :  { %2349 = vmatprep.subr.bf16.mxu1 %v2547_v59 }
 0x116   :  { %2328 = vmatpush3.bf16.msra.mxu0 %v2548_v60 }
 0x117   :  { %2329 = vmatprep.subr.bf16.mxu0 %v2550_v62  ;;  %2350 = vmatpush3.bf16.msra.mxu1 %v2549_v61 }
 0x118   :  { %2351 = vmatprep.subr.bf16.mxu1 %v2551_v63 }
 0x11a   :  { %2330 = vmatpush3.bf16.msra.mxu0 %v2552_v0  ;;  %v2585_v0 = vld [vmem:[#allocation11 + $0x30] sm:$0xff]  }
 0x11b   :  { %2331 = vmatprep.subr.bf16.mxu0 %v2554_v2  ;;  %2352 = vmatpush3.bf16.msra.mxu1 %v2553_v1  ;;  %v2586_v1 = vld [vmem:[#allocation11 + $0x38] sm:$0xff]   ;;  %v2587_v2 = vld [vmem:[#allocation14] sm:$0xff]  }
 0x11c   :  { %2353 = vmatprep.subr.bf16.mxu1 %v2555_v3  ;;  %v2588_v3 = vld [vmem:[#allocation14 + $0x8] sm:$0xff]  }
 0x11e   :  { %2332 = vmatpush3.bf16.msra.mxu0 %v2556_v4  ;;  %v2589_v4 = vld [vmem:[#allocation14 + $0x10] sm:$0xff]  }
 0x11f   :  { %2333 = vmatprep.subr.bf16.mxu0 %v2558_v6  ;;  %2354 = vmatpush3.bf16.msra.mxu1 %v2557_v5  ;;  %v2590_v5 = vld [vmem:[#allocation14 + $0x18] sm:$0xff]   ;;  %v2591_v6 = vld [vmem:[#allocation14 + $0x20] sm:$0xff]  }
 0x120   :  { %2355 = vmatprep.subr.bf16.mxu1 %v2559_v7  ;;  %v2592_v7 = vld [vmem:[#allocation14 + $0x28] sm:$0xff]  }
 0x122   :  { %2334 = vmatpush3.bf16.msra.mxu0 %v2560_v8  ;;  %v2593_v8 = vld [vmem:[#allocation14 + $0x30] sm:$0xff]  }
 0x123   :  { %2335 = vmatprep.subr.bf16.mxu0 %v2562_v10  ;;  %2356 = vmatpush3.bf16.msra.mxu1 %v2561_v9  ;;  %v2179_v9 = vld [vmem:[#allocation10] ss:$0 sm:$0xff] }
 0x124   :  { %2357 = vmatprep.subr.bf16.mxu1 %v2563_v11 }
 0x126   :  { %2336 = vmatpush3.bf16.msra.mxu0 %v2564_v12 }
 0x127   :  { %2337 = vmatprep.subr.bf16.mxu0 %v2566_v14  ;;  %2358 = vmatpush3.bf16.msra.mxu1 %v2565_v13 }
 0x128   :  { %2359 = vmatprep.subr.bf16.mxu1 %v2567_v15 }
 0x12a   :  { %2338 = vmatpush3.bf16.msra.mxu0 %v2568_v16 }
 0x12b   :  { %2360 = vmatpush3.bf16.msra.mxu1 %v2569_v17  ;;  %2403 = vmatprep.subr.bf16.mxu0 %v2962_v21 }
 0x12c   :  { %2423 = vmatprep.subr.bf16.mxu1 %v2962_v21 }
 0x12d   :  { %899 = vmatmul.mubr.bf16.vlgmr.msra.gmra.mrb[4].mxu0 %v375_v18  ;;  %v2594_v18 = vld [vmem:[#allocation14 + $0x38] sm:$0xff]  }
 0x12e   :  { %939 = vmatmul.mubr.bf16.vlgmr.msra.gmra.mrb[4].mxu1 %v391_v19  ;;  %2404 = vmatpush3.bf16.msra.mxu0 %v2571_v20  ;;  %v2595_v19 = vld [vmem:[#allocation17] sm:$0xff]   ;;  %v2596_v20 = vld [vmem:[#allocation17 + $0x8] sm:$0xff]  }
 0x12f   :  { %2405 = vmatprep.subr.bf16.mxu0 %v2962_v21  ;;  %2419 = vmatprep.mubr.msk.bf16.mxu0 %vm2963_vm0, %v2962_v21 }
 0x130   :  { %2439 = vmatprep.mubr.msk.bf16.mxu1 %vm2963_vm0, %v2962_v21  ;;  %2424 = vmatpush3.bf16.msra.mxu1 %v2579_v29 }
 0x131   :  { %2425 = vmatprep.subr.bf16.mxu1 %v2962_v21 }
 0x132   :  { %2406 = vmatpush3.bf16.msra.mxu0 %v2572_v22  ;;  %v2597_v22 = vld [vmem:[#allocation17 + $0x10] sm:$0xff]  }
 0x133   :  { %2407 = vmatprep.subr.bf16.mxu0 %v2962_v21 }
 0x134   :  { %2426 = vmatpush3.bf16.msra.mxu1 %v2580_v31 }
 0x135   :  { %2427 = vmatprep.subr.bf16.mxu1 %v2962_v21 }
 0x136   :  { %2408 = vmatpush3.bf16.msra.mxu0 %v2573_v23  ;;  %v2598_v23 = vld [vmem:[#allocation17 + $0x18] sm:$0xff]  }
 0x137   :  { %2409 = vmatprep.subr.bf16.mxu0 %v2962_v21 }
 0x138   :  { %2428 = vmatpush3.bf16.msra.mxu1 %v2581_v32 }
 0x139   :  { %2429 = vmatprep.subr.bf16.mxu1 %v2962_v21 }
 0x13a   :  { %2410 = vmatpush3.bf16.msra.mxu0 %v2574_v24  ;;  %v2599_v24 = vld [vmem:[#allocation17 + $0x20] sm:$0xff]  }
 0x13b   :  { %2411 = vmatprep.subr.bf16.mxu0 %v2962_v21 }
 0x13c   :  { %2430 = vmatpush3.bf16.msra.mxu1 %v2582_v33 }
 0x13d   :  { %2431 = vmatprep.subr.bf16.mxu1 %v2962_v21 }
 0x13e   :  { %2412 = vmatpush3.bf16.msra.mxu0 %v2575_v25  ;;  %v2600_v25 = vld [vmem:[#allocation17 + $0x28] sm:$0xff]  }
 0x13f   :  { %2413 = vmatprep.subr.bf16.mxu0 %v2962_v21 }
 0x140   :  { %2432 = vmatpush3.bf16.msra.mxu1 %v2583_v34  ;;  %v2601_v34 = vld [vmem:[#allocation17 + $0x30] sm:$0xff]  }
 0x141   :  { %2433 = vmatprep.subr.bf16.mxu1 %v2962_v21 }
 0x142   :  { %2414 = vmatpush3.bf16.msra.mxu0 %v2576_v26  ;;  %v2188_v26 = vld [vmem:[#allocation13] ss:$0 sm:$0xff] }
 0x143   :  { %2415 = vmatprep.subr.bf16.mxu0 %v2962_v21 }
 0x144   :  { %2434 = vmatpush3.bf16.msra.mxu1 %v2584_v35  ;;  %v2602_v35 = vld [vmem:[#allocation17 + $0x38] sm:$0xff]  }
 0x145   :  { %2435 = vmatprep.subr.bf16.mxu1 %v2962_v21 }
 0x146   :  { %2416 = vmatpush3.bf16.msra.mxu0 %v2577_v27 }
 0x147   :  { %2417 = vmatprep.subr.bf16.mxu0 %v2962_v21 }
 0x148   :  { %2436 = vmatpush3.bf16.msra.mxu1 %v2585_v0  ;;  %v1458_v0 = vld [vmem:[#allocation20 + $0x1a0] sm:$0xff] }
 0x149   :  { %2437 = vmatprep.subr.bf16.mxu1 %v2962_v21 }
 0x14a   :  { %2418 = vmatpush3.bf16.msra.mxu0 %v2578_v28 }
 0x14b   :  { %2443 = vmatprep.subr.bf16.mxu0 %v2962_v21 }
 0x14c   :  { %2438 = vmatpush3.bf16.msra.mxu1 %v2586_v1 }
 0x14d   :  { %2463 = vmatprep.subr.bf16.mxu1 %v2962_v21 }
 0x1e0   :  { %v2295_v36 = vpop.f32.mrb[0].mxu0 }
 0x1e1   :  { %v2296_v38 = vpop.f32.mrb[1].mxu0  ;;  %v2317_v39 = vpop.f32.mrb[0].mxu1 }
 0x1e2   :  { %v2297_v40 = vadd.f32 %v2296_v38, %v2295_v36  ;;  %v2298_v41 = vpop.f32.mrb[2].mxu0  ;;  %v2318_v42 = vpop.f32.mrb[1].mxu1  ;;  %v1406_v36 = vld [vmem:[#allocation20] sm:$0xff]  ;;  %v1407_v38 = vld [vmem:[#allocation20 + $0x8] sm:$0xff] }
 0x1e3   :  { %v2299_v43 = vpop.f32.mrb[3].mxu0  ;;  %v2319_v45 = vadd.f32 %v2318_v42, %v2317_v39  ;;  %v2320_v46 = vpop.f32.mrb[2].mxu1  ;;  %v1411_v41 = vld [vmem:[#allocation20 + $0x28] sm:$0xff]  ;;  %v1414_v42 = vld [vmem:[#allocation20 + $0x40] sm:$0xff] }
 0x1e4   :  { %v821_v44 = vadd.f32 %v2297_v40, %v2114_v37  ;;  %v2321_v47 = vpop.f32.mrb[3].mxu1  ;;  %v1410_v37 = vld [vmem:[#allocation20 + $0x20] sm:$0xff] }
 0x1e5   :  { %v2215_v39 = vcombine.low %v1406_v36, %v1410_v37  ;;  %v2216_v40 = vcombine.high %v1406_v36, %v1410_v37  ;;  %v1418_v43 = vld [vmem:[#allocation20 + $0x60] sm:$0xff] }
 0x1e6   :  { %v861_v48 = vadd.f32 %v2319_v45, %v821_v44  ;;  %v2217_v44 = vcombine.low %v1407_v38, %v1411_v41  ;;  %v2218_v45 = vcombine.high %v1407_v38, %v1411_v41  ;;  %v2224_v46 = vcombine.high %v1414_v42, %v1418_v43  ;;  %v1462_v38 = vld [vmem:[#allocation20 + $0x1c0] sm:$0xff] }
 0x1e7   :  { %v2223_v47 = vcombine.low %v1414_v42, %v1418_v43  ;;  %v1467_v42 = vld [vmem:[#allocation20 + $0x1e8] sm:$0xff] }
 0x200   :  { %v2339_v49 = vpop.f32.mrb[4].mxu0 }
 0x201   :  { %v2340_v50 = vpop.f32.mrb[5].mxu0  ;;  %v2361_v51 = vpop.f32.mrb[4].mxu1 }
 0x202   :  { %v2341_v52 = vadd.f32 %v2340_v50, %v2339_v49  ;;  %v2342_v53 = vpop.f32.mrb[6].mxu0  ;;  %v2362_v54 = vpop.f32.mrb[5].mxu1 }
 0x203   :  { %v2343_v55 = vpop.f32.mrb[7].mxu0  ;;  %v2363_v57 = vadd.f32 %v2362_v54, %v2361_v51  ;;  %v2364_v58 = vpop.f32.mrb[6].mxu1  ;;  %v1430_v51 = vld [vmem:[#allocation20 + $0xc0] sm:$0xff] }
 0x204   :  { %v901_v56 = vadd.f32 %v2341_v52, %v861_v48  ;;  %v2365_v59 = vpop.f32.mrb[7].mxu1  ;;  %v1422_v48 = vld [vmem:[#allocation20 + $0x80] sm:$0xff] }
 0x205   :  { %v1434_v52 = vld [vmem:[#allocation20 + $0xe0] sm:$0xff] }
 0x206   :  { %v941_v60 = vadd.f32 %v2363_v57, %v901_v56  ;;  %v2240_v53 = vcombine.high %v1430_v51, %v1434_v52  ;;  %v2239_v54 = vcombine.low %v1430_v51, %v1434_v52  ;;  %v1438_v55 = vld [vmem:[#allocation20 + $0x100] sm:$0xff]  ;;  %v1413_v51 = vld [vmem:[#allocation20 + $0x38] sm:$0xff] }
 0x207   :  { %v1442_v56 = vld [vmem:[#allocation20 + $0x120] sm:$0xff] }
 0x208   :  { %vm946_vm1 = vcmp.gt.f32.partialorder %v941_v60, 0.0  ;;  %v947_v61 = vmul.f32 0.01, %v941_v60  ;;  %v2248_v57 = vcombine.high %v1438_v55, %v1442_v56  ;;  %v2247_v58 = vcombine.low %v1438_v55, %v1442_v56  ;;  %v1446_v59 = vld [vmem:[#allocation20 + $0x140] sm:$0xff] }
 0x20a   :  { %v948_v62 = vsel %vm946_vm1, %v941_v60, %v947_v61  ;;  %v1450_v60 = vld [vmem:[#allocation20 + $0x160] sm:$0xff] }
 0x20b   :  { %v966_v63 = vpack.c.bf16 %v948_v62, %v948_v62  ;;  %v2256_v61 = vcombine.high %v1446_v59, %v1450_v60  ;;  %v2255_v62 = vcombine.low %v1446_v59, %v1450_v60  ;;  %v1416_v59 = vld [vmem:[#allocation20 + $0x50] sm:$0xff] }
 0x20c   :  { %v1420_v60 = vld [vmem:[#allocation20 + $0x70] sm:$0xff] }
 0x20d   :  { %2420 = vmatmul.mubr.bf16.vlgmr.msra.gmra.mrb[8].mxu0 %v966_v63  ;;  %v1454_v63 = vld [vmem:[#allocation20 + $0x180] sm:$0xff] }
 0x20e   :  { %2459 = vmatprep.mubr.msk.bf16.mxu0 %vm2963_vm0, %v2962_v21  ;;  %2444 = vmatpush3.bf16.msra.mxu0 %v2587_v2  ;;  %v2264_v1 = vcombine.high %v1454_v63, %v1458_v0  ;;  %v2263_v2 = vcombine.low %v1454_v63, %v1458_v0  ;;  %v1417_v63 = vld [vmem:[#allocation20 + $0x58] sm:$0xff] }
 0x20f   :  { %2445 = vmatprep.subr.bf16.mxu0 %v2962_v21  ;;  %v1421_v0 = vld [vmem:[#allocation20 + $0x78] sm:$0xff] }
 0x212   :  { %2446 = vmatpush3.bf16.msra.mxu0 %v2588_v3  ;;  %v2197_v3 = vld [vmem:[#allocation16] ss:$0 sm:$0xff] }
 0x213   :  { %2447 = vmatprep.subr.bf16.mxu0 %v2962_v21 }
 0x216   :  { %2448 = vmatpush3.bf16.msra.mxu0 %v2589_v4 }
 0x217   :  { %2449 = vmatprep.subr.bf16.mxu0 %v2962_v21 }
 0x21a   :  { %2450 = vmatpush3.bf16.msra.mxu0 %v2590_v5 }
 0x21b   :  { %2451 = vmatprep.subr.bf16.mxu0 %v2962_v21 }
 0x21e   :  { %2452 = vmatpush3.bf16.msra.mxu0 %v2591_v6 }
 0x21f   :  { %2453 = vmatprep.subr.bf16.mxu0 %v2962_v21 }
 0x222   :  { %2454 = vmatpush3.bf16.msra.mxu0 %v2592_v7 }
 0x223   :  { %2455 = vmatprep.subr.bf16.mxu0 %v2962_v21 }
 0x226   :  { %2456 = vmatpush3.bf16.msra.mxu0 %v2593_v8 }
 0x227   :  { %2457 = vmatprep.subr.bf16.mxu0 %v2962_v21 }
 0x22a   :  { %2458 = vmatpush3.bf16.msra.mxu0 %v2594_v18 }
 0x22b   :  { %1833 = vmatprep.subr.bf16.mxu0 %v2216_v40  ;;  %v1463_v40 = vld [vmem:[#allocation20 + $0x1c8] sm:$0xff] }
 0x2e0   :  { %v1055_v10 = vpop.f32.mrb[8].mxu0 }
 0x2e1   :  { %v1056_v11 = vadd.f32 %v2179_v9, %v1055_v10  ;;  %v2421_v12 = vpop.f32.mrb[9].mxu0  ;;  %v1415_v10 = vld [vmem:[#allocation20 + $0x48] sm:$0xff] }
 0x2e2   :  { %v1058_v13 = vpop.f32.mrb[10].mxu0 }
 0x2e3   :  { %vm1061_vm2 = vcmp.gt.f32.partialorder %v1056_v11, 0.0  ;;  %v1062_v14 = vmul.f32 0.01, %v1056_v11  ;;  %v2422_v15 = vpop.f32.mrb[11].mxu0 }
 0x2e4   :  { %v1423_v15 = vld [vmem:[#allocation20 + $0x88] sm:$0xff] }
 0x2e5   :  { %v1063_v16 = vsel %vm1061_vm2, %v1056_v11, %v1062_v14  ;;  %v1419_v11 = vld [vmem:[#allocation20 + $0x68] sm:$0xff] }
 0x2e6   :  { %v1081_v17 = vpack.c.bf16 %v1063_v16, %v1063_v16  ;;  %v2226_v14 = vcombine.high %v1415_v10, %v1419_v11  ;;  %v1427_v16 = vld [vmem:[#allocation20 + $0xa8] sm:$0xff] }
 0x2e7   :  { %v2234_v18 = vcombine.high %v1423_v15, %v1427_v16 }
 0x2e8   :  { %2440 = vmatmul.mubr.bf16.vlgmr.msra.gmra.mrb[8].mxu1 %v1081_v17  ;;  %v2225_v17 = vcombine.low %v1415_v10, %v1419_v11  ;;  %v2229_v10 = vcombine.low %v1417_v63, %v1421_v0 }
 0x2e9   :  { %2479 = vmatprep.mubr.msk.bf16.mxu1 %vm2963_vm0, %v2962_v21  ;;  %2464 = vmatpush3.bf16.msra.mxu1 %v2595_v19  ;;  %v1431_v19 = vld [vmem:[#allocation20 + $0xc8] sm:$0xff] }
 0x2ea   :  { %2465 = vmatprep.subr.bf16.mxu1 %v2962_v21 }
 0x2ed   :  { %2466 = vmatpush3.bf16.msra.mxu1 %v2596_v20  ;;  %v1435_v20 = vld [vmem:[#allocation20 + $0xe8] sm:$0xff] }
 0x2ee   :  { %2467 = vmatprep.subr.bf16.mxu1 %v2962_v21 }
 0x2f1   :  { %2468 = vmatpush3.bf16.msra.mxu1 %v2597_v22  ;;  %v2233_v22 = vcombine.low %v1423_v15, %v1427_v16  ;;  %v1433_v15 = vld [vmem:[#allocation20 + $0xd8] sm:$0xff] }
 0x2f2   :  { %2469 = vmatprep.subr.bf16.mxu1 %v2962_v21  ;;  %v1437_v16 = vld [vmem:[#allocation20 + $0xf8] sm:$0xff] }
 0x2f5   :  { %2470 = vmatpush3.bf16.msra.mxu1 %v2598_v23  ;;  %v2242_v23 = vcombine.high %v1431_v19, %v1435_v20 }
 0x2f6   :  { %2471 = vmatprep.subr.bf16.mxu1 %v2962_v21 }
 0x2f9   :  { %2472 = vmatpush3.bf16.msra.mxu1 %v2599_v24  ;;  %v1439_v24 = vld [vmem:[#allocation20 + $0x108] sm:$0xff] }
 0x2fa   :  { %2473 = vmatprep.subr.bf16.mxu1 %v2962_v21 }
 0x2fd   :  { %2474 = vmatpush3.bf16.msra.mxu1 %v2600_v25  ;;  %v1443_v25 = vld [vmem:[#allocation20 + $0x128] sm:$0xff] }
 0x2fe   :  { %2475 = vmatprep.subr.bf16.mxu1 %v2962_v21 }
 0x301   :  { %2476 = vmatpush3.bf16.msra.mxu1 %v2601_v34  ;;  %v1459_v34 = vld [vmem:[#allocation20 + $0x1a8] sm:$0xff] }
 0x302   :  { %2477 = vmatprep.subr.bf16.mxu1 %v2962_v21  ;;  %v1426_v21 = vld [vmem:[#allocation20 + $0xa0] sm:$0xff] }
 0x303   :  { %v2232_v49 = vcombine.high %v1422_v48, %v1426_v21  ;;  %v2231_v50 = vcombine.low %v1422_v48, %v1426_v21  ;;  %v1409_v48 = vld [vmem:[#allocation20 + $0x18] sm:$0xff]  ;;  %v2964_v21 = vmov 0  }
 0x304   :  { %v2221_v52 = vcombine.low %v1409_v48, %v1413_v51 }
 0x305   :  { %2478 = vmatpush3.bf16.msra.mxu1 %v2602_v35 }
 0x306   :  { %1874 = vmatprep.subr.bf16.mxu1 %v2218_v45  ;;  %v2274_v45 = vcombine.high %v1463_v40, %v1467_v42 }
 0x3bb   :  { %v1170_v27 = vpop.f32.mrb[8].mxu1 }
 0x3bc   :  { %v1171_v28 = vadd.f32 %v2188_v26, %v1170_v27  ;;  %v2441_v29 = vpop.f32.mrb[9].mxu1  ;;  %v2241_v26 = vcombine.low %v1431_v19, %v1435_v20  ;;  %v2250_v27 = vcombine.high %v1439_v24, %v1443_v25  ;;  %v2246_v20 = vcombine.high %v1433_v15, %v1437_v16 }
 0x3bd   :  { %v1173_v31 = vpop.f32.mrb[10].mxu1  ;;  %v1451_v29 = vld [vmem:[#allocation20 + $0x168] sm:$0xff] }
 0x3be   :  { %v1193_v32 = vpack.c.bf16 %v1171_v28, %v1171_v28  ;;  %v2442_v33 = vpop.f32.mrb[11].mxu1  ;;  %v1447_v28 = vld [vmem:[#allocation20 + $0x148] sm:$0xff]  ;;  %v2249_v31 = vcombine.low %v1439_v24, %v1443_v25  ;;  %v1441_v24 = vld [vmem:[#allocation20 + $0x118] sm:$0xff] }
 0x3bf   :  { %v1455_v33 = vld [vmem:[#allocation20 + $0x188] sm:$0xff]  ;;  %v2257_v35 = vcombine.low %v1447_v28, %v1451_v29  ;;  %v1445_v25 = vld [vmem:[#allocation20 + $0x138] sm:$0xff] }
 0x3c0   :  { %2460 = vmatmul.mubr.bf16.vlgmr.msra.gmra.mrb[12].mxu0 %v1193_v32  ;;  %v2258_v32 = vcombine.high %v1447_v28, %v1451_v29  ;;  %v2266_v36 = vcombine.high %v1455_v33, %v1459_v34  ;;  %v2265_v37 = vcombine.low %v1455_v33, %v1459_v34  ;;  %v2254_v29 = vcombine.high %v1441_v24, %v1445_v25  ;;  %v1449_v33 = vld [vmem:[#allocation20 + $0x158] sm:$0xff] }
 0x3c1   :  { %1834 = vmatpush1.bf16.msra.mxu0 %v2215_v39  ;;  %v1466_v39 = vld [vmem:[#allocation20 + $0x1e0] sm:$0xff]  ;;  %1865 = vmatprep.mubr.bf16.mxu0 %v2964_v21  ;;  %v1453_v34 = vld [vmem:[#allocation20 + $0x178] sm:$0xff] }
 0x3c2   :  { %1835 = vmatprep.subr.bf16.mxu0 %v2224_v46  ;;  %v2272_v41 = vcombine.high %v1462_v38, %v1466_v39  ;;  %v2271_v43 = vcombine.low %v1462_v38, %v1466_v39  ;;  %v1408_v46 = vld [vmem:[#allocation20 + $0x10] sm:$0xff]  ;;  %v2262_v38 = vcombine.high %v1449_v33, %v1453_v34 }
 0x3c3   :  { %v1456_v39 = vld [vmem:[#allocation20 + $0x190] sm:$0xff] }
 0x3c5   :  { %1836 = vmatpush1.bf16.msra.mxu0 %v2223_v47  ;;  %v1412_v47 = vld [vmem:[#allocation20 + $0x30] sm:$0xff] }
 0x3c6   :  { %1837 = vmatprep.subr.bf16.mxu0 %v2232_v49  ;;  %v2219_v49 = vcombine.low %v1408_v46, %v1412_v47 }
 0x3c9   :  { %1838 = vmatpush1.bf16.msra.mxu0 %v2231_v50  ;;  %v2220_v50 = vcombine.high %v1408_v46, %v1412_v47  ;;  %v1464_v47 = vld [vmem:[#allocation20 + $0x1d0] sm:$0xff] }
 0x3ca   :  { %1839 = vmatprep.subr.bf16.mxu0 %v2240_v53  ;;  %v2222_v53 = vcombine.high %v1409_v48, %v1413_v51  ;;  %v1468_v48 = vld [vmem:[#allocation20 + $0x1f0] sm:$0xff] }
 0x3cd   :  { %1840 = vmatpush1.bf16.msra.mxu0 %v2239_v54  ;;  %v2206_v54 = vld [vmem:[#allocation19] ss:$0 sm:$0xff] }
 0x3ce   :  { %1841 = vmatprep.subr.bf16.mxu0 %v2248_v57 }
 0x3d1   :  { %1842 = vmatpush1.bf16.msra.mxu0 %v2247_v58 }
 0x3d2   :  { %1843 = vmatprep.subr.bf16.mxu0 %v2256_v61 }
 0x3d5   :  { %1844 = vmatpush1.bf16.msra.mxu0 %v2255_v62 }
 0x3d6   :  { %1845 = vmatprep.subr.bf16.mxu0 %v2264_v1 }
 0x3d9   :  { %1846 = vmatpush1.bf16.msra.mxu0 %v2263_v2 }
 0x3da   :  { %1847 = vmatprep.subr.bf16.mxu0 %v2272_v41  ;;  %v1457_v41 = vld [vmem:[#allocation20 + $0x198] sm:$0xff] }
 0x3dd   :  { %1848 = vmatpush1.bf16.msra.mxu0 %v2271_v43 }
 0x3de   :  { %1915 = vmatprep.subr.bf16.mxu0 %v2220_v50 }
 0x493   :  { %v1282_v4 = vpop.f32.mrb[12].mxu0 }
 0x494   :  { %v1283_v5 = vadd.f32 %v2197_v3, %v1282_v4  ;;  %v2461_v6 = vpop.f32.mrb[13].mxu0  ;;  %v2228_v3 = vcombine.high %v1416_v59, %v1420_v60  ;;  %v2230_v4 = vcombine.high %v1417_v63, %v1421_v0 }
 0x495   :  { %v1285_v7 = vpop.f32.mrb[14].mxu0  ;;  %v1428_v6 = vld [vmem:[#allocation20 + $0xb0] sm:$0xff] }
 0x496   :  { %vm1288_vm3 = vcmp.gt.f32.partialorder %v1283_v5, 0.0  ;;  %v1289_v8 = vmul.f32 0.01, %v1283_v5  ;;  %v2462_v9 = vpop.f32.mrb[15].mxu0  ;;  %v1425_v7 = vld [vmem:[#allocation20 + $0x98] sm:$0xff] }
 0x497   :  { %v2227_v9 = vcombine.low %v1416_v59, %v1420_v60  ;;  %v1479_v59 = vsub.s32 1, %v3208_v30  ;;  %v1487_v60 = vsub.s32 3, %v3208_v30 }
 0x498   :  { %v1290_v12 = vsel %vm1288_vm3, %v1283_v5, %v1289_v8  ;;  %v1424_v5 = vld [vmem:[#allocation20 + $0x90] sm:$0xff]  ;;  %v1429_v8 = vld [vmem:[#allocation20 + $0xb8] sm:$0xff] }
 0x499   :  { %v1308_v13 = vpack.c.bf16 %v1290_v12, %v1290_v12  ;;  %v2236_v11 = vcombine.high %v1424_v5, %v1428_v6  ;;  %v2238_v12 = vcombine.high %v1425_v7, %v1429_v8 }
 0x49b   :  { %2480 = vmatmul.mubr.bf16.vlgmr.msra.gmra.mrb[12].mxu1 %v1308_v13  ;;  %v1432_v13 = vld [vmem:[#allocation20 + $0xd0] sm:$0xff] }
 0x49c   :  { %1875 = vmatpush1.bf16.msra.mxu1 %v2217_v44  ;;  %v2273_v44 = vcombine.low %v1463_v40, %v1467_v42  ;;  %1906 = vmatprep.mubr.bf16.mxu1 %v2964_v21  ;;  %v1460_v40 = vld [vmem:[#allocation20 + $0x1b0] sm:$0xff]  ;;  %v1461_v42 = vld [vmem:[#allocation20 + $0x1b8] sm:$0xff] }
 0x49d   :  { %1876 = vmatprep.subr.bf16.mxu1 %v2226_v14  ;;  %v1436_v14 = vld [vmem:[#allocation20 + $0xf0] sm:$0xff]  ;;  %v2270_v46 = vcombine.high %v1457_v41, %v1461_v42  ;;  %v2267_v50 = vcombine.low %v1456_v39, %v1460_v40  ;;  %v2269_v51 = vcombine.low %v1457_v41, %v1461_v42 }
 0x49e   :  { %v2244_v19 = vcombine.high %v1432_v13, %v1436_v14 }
 0x4a0   :  { %1877 = vmatpush1.bf16.msra.mxu1 %v2225_v17  ;;  %v2235_v17 = vcombine.low %v1424_v5, %v1428_v6 }
 0x4a1   :  { %1878 = vmatprep.subr.bf16.mxu1 %v2234_v18  ;;  %v2237_v18 = vcombine.low %v1425_v7, %v1429_v8  ;;  %v2619_v7 = vld [vmem:[#allocation2] sm:$0xff] }
 0x4a4   :  { %1879 = vmatpush1.bf16.msra.mxu1 %v2233_v22  ;;  %v1440_v22 = vld [vmem:[#allocation20 + $0x110] sm:$0xff] }
 0x4a5   :  { %1880 = vmatprep.subr.bf16.mxu1 %v2242_v23  ;;  %v1444_v23 = vld [vmem:[#allocation20 + $0x130] sm:$0xff] }
 0x4a6   :  { %v2252_v28 = vcombine.high %v1440_v22, %v1444_v23 }
 0x4a8   :  { %1881 = vmatpush1.bf16.msra.mxu1 %v2241_v26  ;;  %v2243_v26 = vcombine.low %v1432_v13, %v1436_v14 }
 0x4a9   :  { %1882 = vmatprep.subr.bf16.mxu1 %v2250_v27  ;;  %v2245_v27 = vcombine.low %v1433_v15, %v1437_v16 }
 0x4ac   :  { %1883 = vmatpush1.bf16.msra.mxu1 %v2249_v31  ;;  %v1448_v31 = vld [vmem:[#allocation20 + $0x150] sm:$0xff] }
 0x4ad   :  { %1884 = vmatprep.subr.bf16.mxu1 %v2258_v32  ;;  %v1452_v32 = vld [vmem:[#allocation20 + $0x170] sm:$0xff] }
 0x4ae   :  { %v2259_v43 = vcombine.low %v1448_v31, %v1452_v32 }
 0x4b0   :  { %1885 = vmatpush1.bf16.msra.mxu1 %v2257_v35  ;;  %v2251_v35 = vcombine.low %v1440_v22, %v1444_v23 }
 0x4b1   :  { %1886 = vmatprep.subr.bf16.mxu1 %v2266_v36  ;;  %v2253_v36 = vcombine.low %v1441_v24, %v1445_v25 }
 0x4b4   :  { %1887 = vmatpush1.bf16.msra.mxu1 %v2265_v37  ;;  %v2260_v37 = vcombine.high %v1448_v31, %v1452_v32 }
 0x4b5   :  { %1888 = vmatprep.subr.bf16.mxu1 %v2274_v45  ;;  %v2268_v45 = vcombine.high %v1456_v39, %v1460_v40 }
 0x4b8   :  { %1889 = vmatpush1.bf16.msra.mxu1 %v2273_v44  ;;  %v2261_v44 = vcombine.low %v1449_v33, %v1453_v34 }
 0x4b9   :  { %1956 = vmatprep.subr.bf16.mxu1 %v2222_v53 }
 0x56e   :  { %v1397_v55 = vpop.f32.mrb[12].mxu1 }
 0x56f   :  { %v1398_v56 = vadd.f32 %v2206_v54, %v1397_v55  ;;  %v2481_v57 = vpop.f32.mrb[13].mxu1  ;;  %v2275_v54 = vcombine.low %v1464_v47, %v1468_v48 }
 0x570   :  { %v1400_v58 = vpop.f32.mrb[14].mxu1  ;;  %v1483_v57 = vsub.s32 2, %v3208_v30 }
 0x571   :  { %vm1403_vm4 = vcmp.gt.f32.partialorder %v1398_v56, 0.0  ;;  %v1404_v61 = vmul.f32 0.01, %v1398_v56  ;;  %v2482_v62 = vpop.f32.mrb[15].mxu1  ;;  %v1470_v58 = vld [vmem:[#allocation22] sm:$0xff] }
 0x572   :  { %v1484_v0 = vrot.slane %v1470_v58, %v1483_v57 }
 0x573   :  { %v1405_v1 = vsel %vm1403_vm4, %v1398_v56, %v1404_v61  ;;  %v1475_v56 = vsub.s32 0, %v3208_v30  ;;  %v2965_v61 = vmov 1983009808  }
 0x574   :  { %v3264_v2 = vpack.c.bf16 %v1405_v1, %v1405_v1  ;;  %v2011_v62 = vunpack.c.l.s4 %v2965_v61  ;;  %v1480_v1 = vrot.slane %v1470_v58, %v1479_v59  ;;  %v2006_v59 = vunpack.c.h.bf16 %v2619_v7 }
 0x575   :  { %v1476_v63 = vrot.slane %v1470_v58, %v1475_v56 }
 0x576   :  { %1866 = vmatmul.mubr.bf16.vlgmr.msra.gmra.mrb[16].mxu0 %v3264_v2  ;;  %1907 = vmatmul.mubr.bf16.vlgmr.msra.gmra.mrb[16].mxu1 %v3264_v2  ;;  %v2012_v5 = vunpack.c.0.s8 %v2011_v62 }
 0x577   :  { %1916 = vmatpush1.bf16.msra.mxu0 %v2219_v49  ;;  %1957 = vmatpush1.bf16.msra.mxu1 %v2221_v52  ;;  %v1469_v49 = vld [vmem:[#allocation20 + $0x1f8] sm:$0xff]  ;;  %v2276_v52 = vcombine.high %v1464_v47, %v1468_v48  ;;  %v1495_v47 = vsub.s32 5, %v3208_v30  ;;  %v1503_v48 = vsub.s32 7, %v3208_v30 }
 0x578   :  { %1917 = vmatprep.subr.bf16.mxu0 %v2228_v3  ;;  %1958 = vmatprep.subr.bf16.mxu1 %v2230_v4  ;;  %v1488_v3 = vrot.slane %v1470_v58, %v1487_v60 }
 0x579   :  { %1947 = vmatprep.mubr.bf16.mxu0 %v2964_v21  ;;  %1988 = vmatprep.mubr.bf16.mxu1 %v2964_v21  ;;  %v1465_v21 = vld [vmem:[#allocation20 + $0x1d8] sm:$0xff] }
 0x57a   :  { %v2278_v53 = vcombine.high %v1465_v21, %v1469_v49  ;;  %v2277_v55 = vcombine.low %v1465_v21, %v1469_v49 }
 0x57b   :  { %1918 = vmatpush1.bf16.msra.mxu0 %v2227_v9  ;;  %1959 = vmatpush1.bf16.msra.mxu1 %v2229_v10 }
 0x57c   :  { %1919 = vmatprep.subr.bf16.mxu0 %v2236_v11  ;;  %1960 = vmatprep.subr.bf16.mxu1 %v2238_v12 }
 0x57f   :  { %1920 = vmatpush1.bf16.msra.mxu0 %v2235_v17  ;;  %1961 = vmatpush1.bf16.msra.mxu1 %v2237_v18  ;;  %v2015_v18 = vsub.s32 %v2012_v5, %v3208_v30 }
 0x580   :  { %1921 = vmatprep.subr.bf16.mxu0 %v2244_v19  ;;  %1962 = vmatprep.subr.bf16.mxu1 %v2246_v20 }
 0x583   :  { %1922 = vmatpush1.bf16.msra.mxu0 %v2243_v26  ;;  %1963 = vmatpush1.bf16.msra.mxu1 %v2245_v27 }
 0x584   :  { %1923 = vmatprep.subr.bf16.mxu0 %v2252_v28  ;;  %1964 = vmatprep.subr.bf16.mxu1 %v2254_v29 }
 0x587   :  { %1924 = vmatpush1.bf16.msra.mxu0 %v2251_v35  ;;  %1965 = vmatpush1.bf16.msra.mxu1 %v2253_v36 }
 0x588   :  { %1925 = vmatprep.subr.bf16.mxu0 %v2260_v37  ;;  %1966 = vmatprep.subr.bf16.mxu1 %v2262_v38 }
 0x58b   :  { %1926 = vmatpush1.bf16.msra.mxu0 %v2259_v43  ;;  %1967 = vmatpush1.bf16.msra.mxu1 %v2261_v44  ;;  %v1491_v44 = vsub.s32 4, %v3208_v30 }
 0x58c   :  { %1927 = vmatprep.subr.bf16.mxu0 %v2268_v45  ;;  %1968 = vmatprep.subr.bf16.mxu1 %v2270_v46  ;;  %v1499_v45 = vsub.s32 6, %v3208_v30  ;;  %v2026_v30 = vcombine.high %v2006_v59, %v2006_v59 }
 0x58d   :  { %v1492_v21 = vrot.slane %v1470_v58, %v1491_v44 }
 0x58e   :  { %v1500_v49 = vrot.slane %v1470_v58, %v1499_v45 }
 0x58f   :  { %1928 = vmatpush1.bf16.msra.mxu0 %v2267_v50  ;;  %1969 = vmatpush1.bf16.msra.mxu1 %v2269_v51  ;;  %v1496_v50 = vrot.slane %v1470_v58, %v1495_v47  ;;  %v1504_v51 = vrot.slane %v1470_v58, %v1503_v48  ;;  %v2040_v58 = vrot.slane %v2026_v30, %v2015_v18 }
 0x590   :  { %1929 = vmatprep.subr.bf16.mxu0 %v2276_v52  ;;  %1970 = vmatprep.subr.bf16.mxu1 %v2278_v53 }
 0x593   :  { %1930 = vmatpush1.bf16.msra.mxu0 %v2275_v54  ;;  %1971 = vmatpush1.bf16.msra.mxu1 %v2277_v55 }
 0x596   :  { %1948 = vmatmul.mubr.bf16.vlgmr.msra.gmra.mrb[20].mxu0 %v3264_v2  ;;  %1989 = vmatmul.mubr.bf16.vlgmr.msra.gmra.mrb[20].mxu1 %v3264_v2  ;;  %v2005_v2 = vunpack.c.l.bf16 %v2619_v7 }
 0x598   :  { %v2009_v19 = vcombine.high %v2005_v2, %v2005_v2  ;;  %v2016_v20 = vrot.slane %v2005_v2, %v2015_v18 }
 0x59a   :  { %v2023_v22 = vrot.slane %v2009_v19, %v2015_v18  ;;  %v2024_v23 = vcombine.high %v2016_v20, %v2016_v20 }
 0x59c   :  { %v2025_v25 = vcombine.high %v2023_v22, %v2023_v22 }
 0x649   :  { %v1867_v4 = vpop.f32.mrb[16].mxu0  ;;  %v1908_v6 = vpop.f32.mrb[16].mxu1 }
 0x64a   :  { %v1868_v8 = vadd.f32 %v1867_v4, %v1476_v63  ;;  %v1909_v9 = vadd.f32 %v1908_v6, %v1484_v0  ;;  %v1869_v10 = vpop.f32.mrb[17].mxu0  ;;  %v1910_v11 = vpop.f32.mrb[17].mxu1  ;;  %v2042_v6 = vcombine.high %v2040_v58, %v2040_v58 }
 0x64b   :  { %v1870_v12 = vadd.f32 %v1869_v10, %v1480_v1  ;;  %v1911_v13 = vadd.f32 %v1910_v11, %v1488_v3  ;;  %v1871_v14 = vpop.f32.mrb[18].mxu0  ;;  %v1912_v15 = vpop.f32.mrb[18].mxu1  ;;  %v2033_v3 = vrot.slane %v2006_v59, %v2015_v18 }
 0x64c   :  { %2603 = vtanh.f32 %v1868_v8  ;;  %v1872_v16 = vpop.f32.mrb[19].mxu0  ;;  %v1913_v17 = vpop.f32.mrb[19].mxu1 }
 0x64d   :  { %2605 = vtanh.f32 %v1909_v9  ;;  %v2041_v4 = vcombine.high %v2033_v3, %v2033_v3 }
 0x64e   :  { %2607 = vtanh.f32 %v1870_v12 }
 0x64f   :  { %2609 = vtanh.f32 %v1911_v13 }
 0x656   :  { %v2604_v24 = vpop.eup %2603 }
 0x657   :  { %v2606_v26 = vpop.eup %2605  ;;  %v2051_v27 = vsub.f32 %v2604_v24, %v2016_v20 }
 0x658   :  { %v2608_v28 = vpop.eup %2607  ;;  %v2053_v29 = vsub.f32 %v2606_v26, %v2023_v22 }
 0x659   :  { %v2610_v31 = vpop.eup %2609  ;;  %v2059_v32 = vmul.f32 %v2051_v27, %v2051_v27  ;;  %v2052_v33 = vsub.f32 %v2608_v28, %v2024_v23 }
 0x65a   :  { %v2054_v34 = vsub.f32 %v2610_v31, %v2025_v25  ;;  %v2061_v35 = vmul.f32 %v2053_v29, %v2053_v29 }
 0x65b   :  { %v2060_v36 = vmul.f32 %v2052_v33, %v2052_v33  ;;  %v2068_v37 = vsel %vm2067_vm5, %v2059_v32, 0.0 }
 0x65c   :  { %v2062_v38 = vmul.f32 %v2054_v34, %v2054_v34  ;;  %v2071_v41 = vsel %vm2067_vm5, %v2061_v35, 0.0 }
 0x65d   :  { %v2069_v39 = vsel %vm2067_vm5, %v2060_v36, 0.0 }
 0x65e   :  { %v2070_v40 = vadd.f32 %v2069_v39, %v2068_v37  ;;  %v2073_v43 = vsel %vm2067_vm5, %v2062_v38, 0.0 }
 0x660   :  { %v2072_v42 = vadd.f32 %v2071_v41, %v2070_v40 }
 0x662   :  { %v2074_v46 = vadd.f32 %v2073_v43, %v2072_v42 }
 0x669   :  { %v1949_v52 = vpop.f32.mrb[20].mxu0  ;;  %v1990_v53 = vpop.f32.mrb[20].mxu1 }
 0x66a   :  { %v1950_v54 = vadd.f32 %v1949_v52, %v1492_v21  ;;  %v1991_v55 = vadd.f32 %v1990_v53, %v1500_v49  ;;  %v1951_v56 = vpop.f32.mrb[21].mxu0  ;;  %v1992_v57 = vpop.f32.mrb[21].mxu1 }
 0x66b   :  { %v1952_v60 = vadd.f32 %v1951_v56, %v1496_v50  ;;  %v1993_v61 = vadd.f32 %v1992_v57, %v1504_v51  ;;  %v1953_v62 = vpop.f32.mrb[22].mxu0  ;;  %v1994_v63 = vpop.f32.mrb[22].mxu1 }
 0x66c   :  { %2611 = vtanh.f32 %v1950_v54  ;;  %v1954_v0 = vpop.f32.mrb[23].mxu0  ;;  %v1995_v1 = vpop.f32.mrb[23].mxu1 }
 0x66d   :  { %2613 = vtanh.f32 %v1991_v55 }
 0x66e   :  { %2615 = vtanh.f32 %v1952_v60 }
 0x66f   :  { %2617 = vtanh.f32 %v1993_v61 }
 0x676   :  { %v2612_v5 = vpop.eup %2611 }
 0x677   :  { %v2614_v2 = vpop.eup %2613  ;;  %v2055_v8 = vsub.f32 %v2612_v5, %v2033_v3 }
 0x678   :  { %v2616_v9 = vpop.eup %2615  ;;  %v2057_v7 = vsub.f32 %v2614_v2, %v2040_v58 }
 0x679   :  { %v2618_v10 = vpop.eup %2617  ;;  %v2056_v11 = vsub.f32 %v2616_v9, %v2041_v4  ;;  %v2063_v12 = vmul.f32 %v2055_v8, %v2055_v8 }
 0x67a   :  { %v2058_v13 = vsub.f32 %v2618_v10, %v2042_v6  ;;  %v2065_v15 = vmul.f32 %v2057_v7, %v2057_v7 }
 0x67b   :  { %v2064_v14 = vmul.f32 %v2056_v11, %v2056_v11  ;;  %v2075_v16 = vsel %vm2067_vm5, %v2063_v12, 0.0 }
 0x67c   :  { %v2076_v17 = vadd.f32 %v2075_v16, %v2074_v46  ;;  %v2066_v19 = vmul.f32 %v2058_v13, %v2058_v13  ;;  %v2079_v22 = vsel %vm2067_vm5, %v2065_v15, 0.0 }
 0x67d   :  { %v2077_v20 = vsel %vm2067_vm5, %v2064_v14, 0.0 }
 0x67e   :  { %v2078_v18 = vadd.f32 %v2077_v20, %v2076_v17  ;;  %v2081_v24 = vsel %vm2067_vm5, %v2066_v19, 0.0 }
 0x680   :  { %v2080_v23 = vadd.f32 %v2079_v22, %v2078_v18 }
 0x682   :  { %v2082_v25 = vadd.f32 %v2081_v24, %v2080_v23 }
 0x684   :  { %2083 = vadd.xlane.f32.xlu0 %v2082_v25 }
 0x711   :  { %v2084_v26 = vpop.xlane.xlu0 %2083 }
 0x712   :  { %v2085_v27 = vsel %vm2067_vm5, %v2084_v26, 0.0 }
 0x713   :  { %v2086_v28 = vrot.slane %v2085_v27, 4 }
 0x715   :  { %v2087_v29 = vadd.f32 %v2086_v28, %v2085_v27 }
 0x717   :  { %v2088_v31 = vrot.slane %v2087_v29, 2 }
 0x719   :  { %v2089_v32 = vadd.f32 %v2088_v31, %v2087_v29 }
 0x71b   :  { %v2090_v33 = vrot.slane %v2089_v32, 1 }
 0x71d   :  { %v2091_v34 = vadd.f32 %v2090_v33, %v2089_v32 }
 0x71f   :  { %2092 = vst [vmem:[#allocation23] sm:$0xff] %v2091_v34 }
 0x720   :  { %2917 = shalt.err (!%p2914_p10)
}
 0x721   :  { %s2918_s16 = scalar_lea.hbm %s3313_s13, 128 }
 0x722   :  { %p2919_p11 = scmp.ne.s32.totalorder %s3313_s13, %s2918_s16  ;;  %p2922_p12 = scmp.lt.u32.totalorder %s2918_s16, %s3313_s13 }
 0x724   :  { %p2924_p13 = pnand %p2922_p12, %p2919_p11 }
 0x726   :  { %2927 = shalt.err (!%p2924_p13)
}
 0x727   :  { %2102 = dma.vmem_to_hbm [thread:$0]  %s2100_s21, 128, %s3313_s13, [#allocation4]  }
 0x728   :  { %2942 = dma.done.wait [#allocation4], 128  }
 0x729   :  { %2943 = vsyncadd [#allocation4], 4294967168 }
 0x72a   :  { %2106 = vsyncpa [#allocation3], 1 }
 0x72b   :  { %2107 = vsyncpa [#allocation6], 1 }
 0x72c   :  { %2108 = vsyncpa [#allocation9], 1 }
 0x72d   :  { %2109 = vsyncpa [#allocation12], 1 }
 0x72e   :  { %2110 = vsyncpa [#allocation15], 1 }
 0x72f   :  { %2111 = vsyncpa [#allocation18], 1 }
 0x730   :  { %2112 = vsyncpa [#allocation21], 1 }
 0x731   :  { %2113 = vsyncpa [#allocation4], 1 }

</bundles_post_ra>
